<compile_context>
chip_gen: v6e
topology: v6e:2x2x1
jax: 0.10.0
libtpu: 0.0.40
codegen_flags: <defaults>
</compile_context>

<pallas_src>
import math

import jax
import jax.numpy as jnp
from jax import lax
from jax.experimental import pallas as pl
from jax.experimental.pallas import tpu as pltpu

MODE = "LSTM"
INPUT_SIZE = 16
HIDDEN_SIZE = 32
NUM_LAYERS = 2
SEQ_LEN = 8
BATCH = 2


def binarize(w):
    # BinaryNet-style sign binarization (applied to all params in forward()).
    return jnp.where(w >= 0, 1.0, -1.0).astype(w.dtype)


# ----------------------------- Pallas kernel ------------------------------ #
def fused_lstm2_kernel(x_ref, h0_ref, c0_ref,
                       wih0_ref, whh0_ref, b0_ref,
                       w1_ref, b1_ref,
                       y_ref, hT_ref, cT_ref):
    """Two stacked LSTM layers over the whole sequence in one invocation.

    x_ref:    (T*B, I)  flattened sequence (seq-major)
    h0/c0:    (L, B, H) initial states
    wih0:     (I, 4H)   layer-0 input weights, binarized + pre-transposed
    whh0:     (H, 4H)   layer-0 recurrent weights
    w1:       (2H, 4H)  layer-1 [W_ih1^T ; W_hh1^T] stacked (binarized)
    b0/b1:    (1, 4H)   binarize(b_ih) + binarize(b_hh) per layer
    y_ref:    (T*B, H)  layer-1 outputs for all time steps
    hT/cT:    (L, B, H) final states
    """
    H = whh0_ref.shape[0]
    B = h0_ref.shape[1]
    T = x_ref.shape[0] // B

    # Load the (constant) recurrent weights / bias once.
    whh0 = whh0_ref[...]
    w1 = w1_ref[...]
    b1 = b1_ref[...]

    # Hoisted layer-0 input projection for all time steps: one MXU op
    # (T*B, I) @ (I, 4H) instead of T tiny per-step matmuls.
    gx0 = (jnp.dot(x_ref[...], wih0_ref[...],
                   preferred_element_type=jnp.float32)
           + b0_ref[...])

    h_a = h0_ref[0].astype(jnp.float32)   # layer 0 state
    c_a = c0_ref[0].astype(jnp.float32)
    h_b = h0_ref[1].astype(jnp.float32)   # layer 1 state
    c_b = c0_ref[1].astype(jnp.float32)

    def cell(gates, c):
        # PyTorch LSTM gate order: i, f, g, o
        i_g = jax.nn.sigmoid(gates[:, 0 * H:1 * H])
        f_g = jax.nn.sigmoid(gates[:, 1 * H:2 * H])
        g_g = jnp.tanh(gates[:, 2 * H:3 * H])
        o_g = jax.nn.sigmoid(gates[:, 3 * H:4 * H])
        c_new = f_g * c + i_g * g_g
        h_new = o_g * jnp.tanh(c_new)
        return h_new, c_new

    ys = []
    # Fully unrolled static time loop (T is a small compile-time constant);
    # gives the scheduler full visibility across steps and static slicing.
    for t in range(T):
        # Layer 0: recurrent matmul only (input projection was hoisted).
        gates0 = gx0[t * B:(t + 1) * B, :] + jnp.dot(
            h_a, whh0, preferred_element_type=jnp.float32)
        h_a, c_a = cell(gates0, c_a)

        # Layer 1 consumes layer 0's fresh hidden state directly (fused).
        # Single (B, 2H) @ (2H, 4H) matmul replaces two (B, H) @ (H, 4H).
        h_cat = jnp.concatenate([h_a, h_b], axis=1)
        gates1 = jnp.dot(h_cat, w1, preferred_element_type=jnp.float32) + b1
        h_b, c_b = cell(gates1, c_b)
        ys.append(h_b)

    # Single writeback at the end (no per-step masked stores).
    y_ref[...] = jnp.concatenate(ys, axis=0).astype(y_ref.dtype)
    hT_ref[0] = h_a.astype(hT_ref.dtype)
    hT_ref[1] = h_b.astype(hT_ref.dtype)
    cT_ref[0] = c_a.astype(cT_ref.dtype)
    cT_ref[1] = c_b.astype(cT_ref.dtype)


# ------------------------------ Module glue ------------------------------- #
def init_params(key, input_size, hidden_size, num_layers):
    """Matches RNNBase.__init__/reset_parameters: uniform(-1/sqrt(H), 1/sqrt(H))."""
    stdv = 1.0 / math.sqrt(hidden_size)
    gate_size = 4 * hidden_size  # LSTM
    params = []
    for layer in range(num_layers):
        layer_input = input_size if layer == 0 else hidden_size
        key, k1, k2, k3, k4 = jax.random.split(key, 5)
        w_ih = jax.random.uniform(k1, (gate_size, layer_input), jnp.float32, -stdv, stdv)
        w_hh = jax.random.uniform(k2, (gate_size, hidden_size), jnp.float32, -stdv, stdv)
        b_ih = jax.random.uniform(k3, (gate_size,), jnp.float32, -stdv, stdv)
        b_hh = jax.random.uniform(k4, (gate_size,), jnp.float32, -stdv, stdv)
        params.append((w_ih, w_hh, b_ih, b_hh))
    return params


def rnn_base_forward(x, params, hx=None):
    """Mirror of RNNBase.forward for mode='LSTM', unpacked input, dropout=0."""
    T, B, I = x.shape
    H = HIDDEN_SIZE
    G = 4 * H
    L = NUM_LAYERS

    if hx is None:
        h0 = jnp.zeros((L, B, H), x.dtype)
        c0 = jnp.zeros_like(h0)
    else:
        h0, c0 = hx

    (w_ih0, w_hh0, b_ih0, b_hh0), (w_ih1, w_hh1, b_ih1, b_hh1) = params

    # forward() binarizes every parameter before the recurrent op.
    # Pre-transpose weights once here so the kernel's MXU operands are
    # lane-dense (last dim = 4H = 128) and no in-kernel transpose is needed.
    wih0_t = binarize(w_ih0).T                                  # (I, 4H)
    whh0_t = binarize(w_hh0).T                                  # (H, 4H)
    b0 = (binarize(b_ih0) + binarize(b_hh0)).reshape(1, G)      # (1, 4H)
    # Layer 1: stack [W_ih1^T ; W_hh1^T] so the per-step recurrence is a
    # single (B, 2H) @ (2H, 4H) matmul against concat([h_layer0, h_layer1]).
    w1_stacked = jnp.concatenate(
        [binarize(w_ih1).T, binarize(w_hh1).T], axis=0)         # (2H, 4H)
    b1 = (binarize(b_ih1) + binarize(b_hh1)).reshape(1, G)      # (1, 4H)

    x_flat = x.reshape(T * B, I)

    y_flat, hT, cT = pl.pallas_call(
        fused_lstm2_kernel,
        out_shape=(jax.ShapeDtypeStruct((T * B, H), x.dtype),
                   jax.ShapeDtypeStruct((L, B, H), x.dtype),
                   jax.ShapeDtypeStruct((L, B, H), x.dtype)),
        grid=(1,),   # single invocation; time recurrence is an in-kernel loop
        in_specs=[
            pl.BlockSpec((T * B, I), lambda i: (0, 0)),     # x (flattened)
            pl.BlockSpec((L, B, H), lambda i: (0, 0, 0)),   # h0
            pl.BlockSpec((L, B, H), lambda i: (0, 0, 0)),   # c0
            pl.BlockSpec((I, G), lambda i: (0, 0)),         # W_ih layer 0 (bin, T)
            pl.BlockSpec((H, G), lambda i: (0, 0)),         # W_hh layer 0
            pl.BlockSpec((1, G), lambda i: (0, 0)),         # bias  layer 0
            pl.BlockSpec((2 * H, G), lambda i: (0, 0)),     # stacked layer-1 W
            pl.BlockSpec((1, G), lambda i: (0, 0)),         # bias  layer 1
        ],
        out_specs=(
            pl.BlockSpec((T * B, H), lambda i: (0, 0)),     # y (flattened)
            pl.BlockSpec((L, B, H), lambda i: (0, 0, 0)),   # h_T
            pl.BlockSpec((L, B, H), lambda i: (0, 0, 0)),   # c_T
        ),
        compiler_params=pltpu.CompilerParams(
            dimension_semantics=("arbitrary",)),
    )(x_flat, h0, c0, wih0_t, whh0_t, b0, w1_stacked, b1)

    output = y_flat.reshape(T, B, H)          # (T, B, H)
    hidden = (hT, cT)                         # each (num_layers, B, H)
    # TODO(synk): inter-layer dropout (training mode, dropout>0), packed
    # sequences and bidirectional=True are not modelled (forward here matches
    # the default inference configuration).
    return output, hidden


# --------------------------- Pure-JAX reference ---------------------------- #
def reference_forward(x, params):
    T, B, _ = x.shape
    layer_in = x
    h_finals, c_finals = [], []
    for layer in range(NUM_LAYERS):
        w_ih, w_hh, b_ih, b_hh = params[layer]
        w_ih_b, w_hh_b = binarize(w_ih), binarize(w_hh)
        b = binarize(b_ih) + binarize(b_hh)
        h0 = jnp.zeros((B, HIDDEN_SIZE), jnp.float32)
        c0 = jnp.zeros((B, HIDDEN_SIZE), jnp.float32)

        def step(carry, xt):
            h, c = carry
            gates = xt @ w_ih_b.T + h @ w_hh_b.T + b
            H = HIDDEN_SIZE
            i = jax.nn.sigmoid(gates[:, 0 * H:1 * H])
            f = jax.nn.sigmoid(gates[:, 1 * H:2 * H])
            g = jnp.tanh(gates[:, 2 * H:3 * H])
            o = jax.nn.sigmoid(gates[:, 3 * H:4 * H])
            c_new = f * c + i * g
            h_new = o * jnp.tanh(c_new)
            return (h_new, c_new), h_new

        (hT, cT), ys = lax.scan(step, (h0, c0), layer_in)
        h_finals.append(hT)
        c_finals.append(cT)
        layer_in = ys
    return layer_in, (jnp.stack(h_finals), jnp.stack(c_finals))


if __name__ == "__main__":
    key = jax.random.PRNGKey(0)
    kp, kx = jax.random.split(key)
    params = init_params(kp, INPUT_SIZE, HIDDEN_SIZE, NUM_LAYERS)
    x = jax.random.normal(kx, (SEQ_LEN, BATCH, INPUT_SIZE), jnp.float32)

    forward = jax.jit(rnn_base_forward)
    out, (h_n, c_n) = forward(x, params)
    out = jax.block_until_ready(out)
    h_n = jax.block_until_ready(h_n)
    c_n = jax.block_until_ready(c_n)

    ref_out, (ref_h, ref_c) = reference_forward(x, params)
    assert out.shape == (SEQ_LEN, BATCH, HIDDEN_SIZE)
    assert h_n.shape == (NUM_LAYERS, BATCH, HIDDEN_SIZE)
    assert c_n.shape == (NUM_LAYERS, BATCH, HIDDEN_SIZE)
    assert jnp.allclose(out, ref_out, atol=1e-5, rtol=1e-5)
    assert jnp.allclose(h_n, ref_h, atol=1e-5, rtol=1e-5)
    assert jnp.allclose(c_n, ref_c, atol=1e-5, rtol=1e-5)

    print("KERNEL_OK")
</pallas_src>

<mosaic_0001>
module attributes {stable_mosaic.version = 11 : i64} {
  func.func @fused_lstm2_kernel(%arg0: i32, %arg1: memref<16x16xf32, #tpu.memory_space<vmem>>, %arg2: memref<2x2x32xf32, #tpu.memory_space<vmem>>, %arg3: memref<2x2x32xf32, #tpu.memory_space<vmem>>, %arg4: memref<16x128xf32, #tpu.memory_space<vmem>>, %arg5: memref<32x128xf32, #tpu.memory_space<vmem>>, %arg6: memref<1x128xf32, #tpu.memory_space<vmem>>, %arg7: memref<64x128xf32, #tpu.memory_space<vmem>>, %arg8: memref<1x128xf32, #tpu.memory_space<vmem>>, %arg9: memref<16x32xf32, #tpu.memory_space<vmem>>, %arg10: memref<2x2x32xf32, #tpu.memory_space<vmem>>, %arg11: memref<2x2x32xf32, #tpu.memory_space<vmem>>) attributes {dimension_semantics = [#tpu.dimension_semantics<arbitrary>], iteration_bounds = array<i64: 1>, scalar_prefetch = 0 : i64, scratch_operands = 0 : i64, tpu.core_type = #tpu.core_type<tc>, window_params = [{pipeline_mode = #tpu.pipeline_mode<synchronous>, transform_indices = @transform_0, window_bounds = array<i64: 16, 16>}, {pipeline_mode = #tpu.pipeline_mode<synchronous>, transform_indices = @transform_1, window_bounds = array<i64: 2, 2, 32>}, {pipeline_mode = #tpu.pipeline_mode<synchronous>, transform_indices = @transform_2, window_bounds = array<i64: 2, 2, 32>}, {pipeline_mode = #tpu.pipeline_mode<synchronous>, transform_indices = @transform_3, window_bounds = array<i64: 16, 128>}, {pipeline_mode = #tpu.pipeline_mode<synchronous>, transform_indices = @transform_4, window_bounds = array<i64: 32, 128>}, {pipeline_mode = #tpu.pipeline_mode<synchronous>, transform_indices = @transform_5, window_bounds = array<i64: 1, 128>}, {pipeline_mode = #tpu.pipeline_mode<synchronous>, transform_indices = @transform_6, window_bounds = array<i64: 64, 128>}, {pipeline_mode = #tpu.pipeline_mode<synchronous>, transform_indices = @transform_7, window_bounds = array<i64: 1, 128>}, {pipeline_mode = #tpu.pipeline_mode<synchronous>, transform_indices = @transform_8, window_bounds = array<i64: 16, 32>}, {pipeline_mode = #tpu.pipeline_mode<synchronous>, transform_indices = @transform_9, window_bounds = array<i64: 2, 2, 32>}, {pipeline_mode = #tpu.pipeline_mode<synchronous>, transform_indices = @transform_10, window_bounds = array<i64: 2, 2, 32>}]} {
    %c0 = arith.constant 0 : index
    %c0_0 = arith.constant 0 : index
    %0 = vector.load %arg5[%c0, %c0_0] : memref<32x128xf32, #tpu.memory_space<vmem>>, vector<32x128xf32>
    %c0_1 = arith.constant 0 : index
    %c0_2 = arith.constant 0 : index
    %1 = vector.load %arg7[%c0_1, %c0_2] : memref<64x128xf32, #tpu.memory_space<vmem>>, vector<64x128xf32>
    %c0_3 = arith.constant 0 : index
    %c0_4 = arith.constant 0 : index
    %2 = vector.load %arg8[%c0_3, %c0_4] : memref<1x128xf32, #tpu.memory_space<vmem>>, vector<1x128xf32>
    %c0_5 = arith.constant 0 : index
    %c0_6 = arith.constant 0 : index
    %3 = vector.load %arg1[%c0_5, %c0_6] : memref<16x16xf32, #tpu.memory_space<vmem>>, vector<16x16xf32>
    %c0_7 = arith.constant 0 : index
    %c0_8 = arith.constant 0 : index
    %4 = vector.load %arg4[%c0_7, %c0_8] : memref<16x128xf32, #tpu.memory_space<vmem>>, vector<16x128xf32>
    %cst = arith.constant dense<0.000000e+00> : vector<16x128xf32>
    %5 = tpu.matmul %3, %4, %cst {dimension_numbers = #tpu.dot_dimension_numbers<[1], [0], [0], [1], [0, 0, 1, 1], [], []>} : vector<16x16xf32>, vector<16x128xf32>, vector<16x128xf32> -> vector<16x128xf32>
    %c0_9 = arith.constant 0 : index
    %c0_10 = arith.constant 0 : index
    %6 = vector.load %arg6[%c0_9, %c0_10] : memref<1x128xf32, #tpu.memory_space<vmem>>, vector<1x128xf32>
    %7 = vector.broadcast %6 : vector<1x128xf32> to vector<16x128xf32>
    %8 = arith.addf %5, %7 : vector<16x128xf32>
    %c0_11 = arith.constant 0 : index
    %c0_12 = arith.constant 0 : index
    %c0_13 = arith.constant 0 : index
    %9 = vector.load %arg2[%c0_11, %c0_12, %c0_13] : memref<2x2x32xf32, #tpu.memory_space<vmem>>, vector<1x2x32xf32>
    %10 = vector.shape_cast %9 : vector<1x2x32xf32> to vector<2x32xf32>
    %c0_14 = arith.constant 0 : index
    %c0_15 = arith.constant 0 : index
    %c0_16 = arith.constant 0 : index
    %11 = vector.load %arg3[%c0_14, %c0_15, %c0_16] : memref<2x2x32xf32, #tpu.memory_space<vmem>>, vector<1x2x32xf32>
    %12 = vector.shape_cast %11 : vector<1x2x32xf32> to vector<2x32xf32>
    %c1 = arith.constant 1 : index
    %c0_17 = arith.constant 0 : index
    %c0_18 = arith.constant 0 : index
    %13 = vector.load %arg2[%c1, %c0_17, %c0_18] : memref<2x2x32xf32, #tpu.memory_space<vmem>>, vector<1x2x32xf32>
    %14 = vector.shape_cast %13 : vector<1x2x32xf32> to vector<2x32xf32>
    %c1_19 = arith.constant 1 : index
    %c0_20 = arith.constant 0 : index
    %c0_21 = arith.constant 0 : index
    %15 = vector.load %arg3[%c1_19, %c0_20, %c0_21] : memref<2x2x32xf32, #tpu.memory_space<vmem>>, vector<1x2x32xf32>
    %16 = vector.shape_cast %15 : vector<1x2x32xf32> to vector<2x32xf32>
    %17 = vector.extract_strided_slice %8 {offsets = [0, 0], sizes = [2, 128], strides = [1, 1]} : vector<16x128xf32> to vector<2x128xf32>
    %cst_22 = arith.constant dense<0.000000e+00> : vector<2x128xf32>
    %18 = tpu.matmul %10, %0, %cst_22 {dimension_numbers = #tpu.dot_dimension_numbers<[1], [0], [0], [1], [0, 0, 1, 1], [], []>} : vector<2x32xf32>, vector<32x128xf32>, vector<2x128xf32> -> vector<2x128xf32>
    %19 = arith.addf %17, %18 : vector<2x128xf32>
    %20 = vector.extract_strided_slice %19 {offsets = [0, 0], sizes = [2, 32], strides = [1, 1]} : vector<2x128xf32> to vector<2x32xf32>
    %21 = arith.negf %20 : vector<2x32xf32>
    %22 = math.exp %21 : vector<2x32xf32>
    %cst_23 = arith.constant 1.000000e+00 : f32
    %23 = vector.broadcast %cst_23 : f32 to vector<2x32xf32>
    %24 = arith.addf %23, %22 : vector<2x32xf32>
    %25 = arith.divf %23, %24 : vector<2x32xf32>
    %26 = vector.extract_strided_slice %19 {offsets = [0, 32], sizes = [2, 32], strides = [1, 1]} : vector<2x128xf32> to vector<2x32xf32>
    %27 = arith.negf %26 : vector<2x32xf32>
    %28 = math.exp %27 : vector<2x32xf32>
    %cst_24 = arith.constant 1.000000e+00 : f32
    %29 = vector.broadcast %cst_24 : f32 to vector<2x32xf32>
    %30 = arith.addf %29, %28 : vector<2x32xf32>
    %31 = arith.divf %29, %30 : vector<2x32xf32>
    %32 = vector.extract_strided_slice %19 {offsets = [0, 64], sizes = [2, 32], strides = [1, 1]} : vector<2x128xf32> to vector<2x32xf32>
    %33 = math.tanh %32 : vector<2x32xf32>
    %34 = vector.extract_strided_slice %19 {offsets = [0, 96], sizes = [2, 32], strides = [1, 1]} : vector<2x128xf32> to vector<2x32xf32>
    %35 = arith.negf %34 : vector<2x32xf32>
    %36 = math.exp %35 : vector<2x32xf32>
    %cst_25 = arith.constant 1.000000e+00 : f32
    %37 = vector.broadcast %cst_25 : f32 to vector<2x32xf32>
    %38 = arith.addf %37, %36 : vector<2x32xf32>
    %39 = arith.divf %37, %38 : vector<2x32xf32>
    %40 = arith.mulf %31, %12 : vector<2x32xf32>
    %41 = arith.mulf %25, %33 : vector<2x32xf32>
    %42 = arith.addf %40, %41 : vector<2x32xf32>
    %43 = math.tanh %42 : vector<2x32xf32>
    %44 = arith.mulf %39, %43 : vector<2x32xf32>
    %45 = tpu.concatenate %44, %14 in 1 : vector<2x32xf32>, vector<2x32xf32> -> vector<2x64xf32>
    %cst_26 = arith.constant dense<0.000000e+00> : vector<2x128xf32>
    %46 = tpu.matmul %45, %1, %cst_26 {dimension_numbers = #tpu.dot_dimension_numbers<[1], [0], [0], [1], [0, 0, 1, 1], [], []>} : vector<2x64xf32>, vector<64x128xf32>, vector<2x128xf32> -> vector<2x128xf32>
    %47 = vector.broadcast %2 : vector<1x128xf32> to vector<2x128xf32>
    %48 = arith.addf %46, %47 : vector<2x128xf32>
    %49 = vector.extract_strided_slice %48 {offsets = [0, 0], sizes = [2, 32], strides = [1, 1]} : vector<2x128xf32> to vector<2x32xf32>
    %50 = arith.negf %49 : vector<2x32xf32>
    %51 = math.exp %50 : vector<2x32xf32>
    %cst_27 = arith.constant 1.000000e+00 : f32
    %52 = vector.broadcast %cst_27 : f32 to vector<2x32xf32>
    %53 = arith.addf %52, %51 : vector<2x32xf32>
    %54 = arith.divf %52, %53 : vector<2x32xf32>
    %55 = vector.extract_strided_slice %48 {offsets = [0, 32], sizes = [2, 32], strides = [1, 1]} : vector<2x128xf32> to vector<2x32xf32>
    %56 = arith.negf %55 : vector<2x32xf32>
    %57 = math.exp %56 : vector<2x32xf32>
    %cst_28 = arith.constant 1.000000e+00 : f32
    %58 = vector.broadcast %cst_28 : f32 to vector<2x32xf32>
    %59 = arith.addf %58, %57 : vector<2x32xf32>
    %60 = arith.divf %58, %59 : vector<2x32xf32>
    %61 = vector.extract_strided_slice %48 {offsets = [0, 64], sizes = [2, 32], strides = [1, 1]} : vector<2x128xf32> to vector<2x32xf32>
    %62 = math.tanh %61 : vector<2x32xf32>
    %63 = vector.extract_strided_slice %48 {offsets = [0, 96], sizes = [2, 32], strides = [1, 1]} : vector<2x128xf32> to vector<2x32xf32>
    %64 = arith.negf %63 : vector<2x32xf32>
    %65 = math.exp %64 : vector<2x32xf32>
    %cst_29 = arith.constant 1.000000e+00 : f32
    %66 = vector.broadcast %cst_29 : f32 to vector<2x32xf32>
    %67 = arith.addf %66, %65 : vector<2x32xf32>
    %68 = arith.divf %66, %67 : vector<2x32xf32>
    %69 = arith.mulf %60, %16 : vector<2x32xf32>
    %70 = arith.mulf %54, %62 : vector<2x32xf32>
    %71 = arith.addf %69, %70 : vector<2x32xf32>
    %72 = math.tanh %71 : vector<2x32xf32>
    %73 = arith.mulf %68, %72 : vector<2x32xf32>
    %74 = vector.extract_strided_slice %8 {offsets = [2, 0], sizes = [2, 128], strides = [1, 1]} : vector<16x128xf32> to vector<2x128xf32>
    %cst_30 = arith.constant dense<0.000000e+00> : vector<2x128xf32>
    %75 = tpu.matmul %44, %0, %cst_30 {dimension_numbers = #tpu.dot_dimension_numbers<[1], [0], [0], [1], [0, 0, 1, 1], [], []>} : vector<2x32xf32>, vector<32x128xf32>, vector<2x128xf32> -> vector<2x128xf32>
    %76 = arith.addf %74, %75 : vector<2x128xf32>
    %77 = vector.extract_strided_slice %76 {offsets = [0, 0], sizes = [2, 32], strides = [1, 1]} : vector<2x128xf32> to vector<2x32xf32>
    %78 = arith.negf %77 : vector<2x32xf32>
    %79 = math.exp %78 : vector<2x32xf32>
    %cst_31 = arith.constant 1.000000e+00 : f32
    %80 = vector.broadcast %cst_31 : f32 to vector<2x32xf32>
    %81 = arith.addf %80, %79 : vector<2x32xf32>
    %82 = arith.divf %80, %81 : vector<2x32xf32>
    %83 = vector.extract_strided_slice %76 {offsets = [0, 32], sizes = [2, 32], strides = [1, 1]} : vector<2x128xf32> to vector<2x32xf32>
    %84 = arith.negf %83 : vector<2x32xf32>
    %85 = math.exp %84 : vector<2x32xf32>
    %cst_32 = arith.constant 1.000000e+00 : f32
    %86 = vector.broadcast %cst_32 : f32 to vector<2x32xf32>
    %87 = arith.addf %86, %85 : vector<2x32xf32>
    %88 = arith.divf %86, %87 : vector<2x32xf32>
    %89 = vector.extract_strided_slice %76 {offsets = [0, 64], sizes = [2, 32], strides = [1, 1]} : vector<2x128xf32> to vector<2x32xf32>
    %90 = math.tanh %89 : vector<2x32xf32>
    %91 = vector.extract_strided_slice %76 {offsets = [0, 96], sizes = [2, 32], strides = [1, 1]} : vector<2x128xf32> to vector<2x32xf32>
    %92 = arith.negf %91 : vector<2x32xf32>
    %93 = math.exp %92 : vector<2x32xf32>
    %cst_33 = arith.constant 1.000000e+00 : f32
    %94 = vector.broadcast %cst_33 : f32 to vector<2x32xf32>
    %95 = arith.addf %94, %93 : vector<2x32xf32>
    %96 = arith.divf %94, %95 : vector<2x32xf32>
    %97 = arith.mulf %88, %42 : vector<2x32xf32>
    %98 = arith.mulf %82, %90 : vector<2x32xf32>
    %99 = arith.addf %97, %98 : vector<2x32xf32>
    %100 = math.tanh %99 : vector<2x32xf32>
    %101 = arith.mulf %96, %100 : vector<2x32xf32>
    %102 = tpu.concatenate %101, %73 in 1 : vector<2x32xf32>, vector<2x32xf32> -> vector<2x64xf32>
    %cst_34 = arith.constant dense<0.000000e+00> : vector<2x128xf32>
    %103 = tpu.matmul %102, %1, %cst_34 {dimension_numbers = #tpu.dot_dimension_numbers<[1], [0], [0], [1], [0, 0, 1, 1], [], []>} : vector<2x64xf32>, vector<64x128xf32>, vector<2x128xf32> -> vector<2x128xf32>
    %104 = vector.broadcast %2 : vector<1x128xf32> to vector<2x128xf32>
    %105 = arith.addf %103, %104 : vector<2x128xf32>
    %106 = vector.extract_strided_slice %105 {offsets = [0, 0], sizes = [2, 32], strides = [1, 1]} : vector<2x128xf32> to vector<2x32xf32>
    %107 = arith.negf %106 : vector<2x32xf32>
    %108 = math.exp %107 : vector<2x32xf32>
    %cst_35 = arith.constant 1.000000e+00 : f32
    %109 = vector.broadcast %cst_35 : f32 to vector<2x32xf32>
    %110 = arith.addf %109, %108 : vector<2x32xf32>
    %111 = arith.divf %109, %110 : vector<2x32xf32>
    %112 = vector.extract_strided_slice %105 {offsets = [0, 32], sizes = [2, 32], strides = [1, 1]} : vector<2x128xf32> to vector<2x32xf32>
    %113 = arith.negf %112 : vector<2x32xf32>
    %114 = math.exp %113 : vector<2x32xf32>
    %cst_36 = arith.constant 1.000000e+00 : f32
    %115 = vector.broadcast %cst_36 : f32 to vector<2x32xf32>
    %116 = arith.addf %115, %114 : vector<2x32xf32>
    %117 = arith.divf %115, %116 : vector<2x32xf32>
    %118 = vector.extract_strided_slice %105 {offsets = [0, 64], sizes = [2, 32], strides = [1, 1]} : vector<2x128xf32> to vector<2x32xf32>
    %119 = math.tanh %118 : vector<2x32xf32>
    %120 = vector.extract_strided_slice %105 {offsets = [0, 96], sizes = [2, 32], strides = [1, 1]} : vector<2x128xf32> to vector<2x32xf32>
    %121 = arith.negf %120 : vector<2x32xf32>
    %122 = math.exp %121 : vector<2x32xf32>
    %cst_37 = arith.constant 1.000000e+00 : f32
    %123 = vector.broadcast %cst_37 : f32 to vector<2x32xf32>
    %124 = arith.addf %123, %122 : vector<2x32xf32>
    %125 = arith.divf %123, %124 : vector<2x32xf32>
    %126 = arith.mulf %117, %71 : vector<2x32xf32>
    %127 = arith.mulf %111, %119 : vector<2x32xf32>
    %128 = arith.addf %126, %127 : vector<2x32xf32>
    %129 = math.tanh %128 : vector<2x32xf32>
    %130 = arith.mulf %125, %129 : vector<2x32xf32>
    %131 = vector.extract_strided_slice %8 {offsets = [4, 0], sizes = [2, 128], strides = [1, 1]} : vector<16x128xf32> to vector<2x128xf32>
    %cst_38 = arith.constant dense<0.000000e+00> : vector<2x128xf32>
    %132 = tpu.matmul %101, %0, %cst_38 {dimension_numbers = #tpu.dot_dimension_numbers<[1], [0], [0], [1], [0, 0, 1, 1], [], []>} : vector<2x32xf32>, vector<32x128xf32>, vector<2x128xf32> -> vector<2x128xf32>
    %133 = arith.addf %131, %132 : vector<2x128xf32>
    %134 = vector.extract_strided_slice %133 {offsets = [0, 0], sizes = [2, 32], strides = [1, 1]} : vector<2x128xf32> to vector<2x32xf32>
    %135 = arith.negf %134 : vector<2x32xf32>
    %136 = math.exp %135 : vector<2x32xf32>
    %cst_39 = arith.constant 1.000000e+00 : f32
    %137 = vector.broadcast %cst_39 : f32 to vector<2x32xf32>
    %138 = arith.addf %137, %136 : vector<2x32xf32>
    %139 = arith.divf %137, %138 : vector<2x32xf32>
    %140 = vector.extract_strided_slice %133 {offsets = [0, 32], sizes = [2, 32], strides = [1, 1]} : vector<2x128xf32> to vector<2x32xf32>
    %141 = arith.negf %140 : vector<2x32xf32>
    %142 = math.exp %141 : vector<2x32xf32>
    %cst_40 = arith.constant 1.000000e+00 : f32
    %143 = vector.broadcast %cst_40 : f32 to vector<2x32xf32>
    %144 = arith.addf %143, %142 : vector<2x32xf32>
    %145 = arith.divf %143, %144 : vector<2x32xf32>
    %146 = vector.extract_strided_slice %133 {offsets = [0, 64], sizes = [2, 32], strides = [1, 1]} : vector<2x128xf32> to vector<2x32xf32>
    %147 = math.tanh %146 : vector<2x32xf32>
    %148 = vector.extract_strided_slice %133 {offsets = [0, 96], sizes = [2, 32], strides = [1, 1]} : vector<2x128xf32> to vector<2x32xf32>
    %149 = arith.negf %148 : vector<2x32xf32>
    %150 = math.exp %149 : vector<2x32xf32>
    %cst_41 = arith.constant 1.000000e+00 : f32
    %151 = vector.broadcast %cst_41 : f32 to vector<2x32xf32>
    %152 = arith.addf %151, %150 : vector<2x32xf32>
    %153 = arith.divf %151, %152 : vector<2x32xf32>
    %154 = arith.mulf %145, %99 : vector<2x32xf32>
    %155 = arith.mulf %139, %147 : vector<2x32xf32>
    %156 = arith.addf %154, %155 : vector<2x32xf32>
    %157 = math.tanh %156 : vector<2x32xf32>
    %158 = arith.mulf %153, %157 : vector<2x32xf32>
    %159 = tpu.concatenate %158, %130 in 1 : vector<2x32xf32>, vector<2x32xf32> -> vector<2x64xf32>
    %cst_42 = arith.constant dense<0.000000e+00> : vector<2x128xf32>
    %160 = tpu.matmul %159, %1, %cst_42 {dimension_numbers = #tpu.dot_dimension_numbers<[1], [0], [0], [1], [0, 0, 1, 1], [], []>} : vector<2x64xf32>, vector<64x128xf32>, vector<2x128xf32> -> vector<2x128xf32>
    %161 = vector.broadcast %2 : vector<1x128xf32> to vector<2x128xf32>
    %162 = arith.addf %160, %161 : vector<2x128xf32>
    %163 = vector.extract_strided_slice %162 {offsets = [0, 0], sizes = [2, 32], strides = [1, 1]} : vector<2x128xf32> to vector<2x32xf32>
    %164 = arith.negf %163 : vector<2x32xf32>
    %165 = math.exp %164 : vector<2x32xf32>
    %cst_43 = arith.constant 1.000000e+00 : f32
    %166 = vector.broadcast %cst_43 : f32 to vector<2x32xf32>
    %167 = arith.addf %166, %165 : vector<2x32xf32>
    %168 = arith.divf %166, %167 : vector<2x32xf32>
    %169 = vector.extract_strided_slice %162 {offsets = [0, 32], sizes = [2, 32], strides = [1, 1]} : vector<2x128xf32> to vector<2x32xf32>
    %170 = arith.negf %169 : vector<2x32xf32>
    %171 = math.exp %170 : vector<2x32xf32>
    %cst_44 = arith.constant 1.000000e+00 : f32
    %172 = vector.broadcast %cst_44 : f32 to vector<2x32xf32>
    %173 = arith.addf %172, %171 : vector<2x32xf32>
    %174 = arith.divf %172, %173 : vector<2x32xf32>
    %175 = vector.extract_strided_slice %162 {offsets = [0, 64], sizes = [2, 32], strides = [1, 1]} : vector<2x128xf32> to vector<2x32xf32>
    %176 = math.tanh %175 : vector<2x32xf32>
    %177 = vector.extract_strided_slice %162 {offsets = [0, 96], sizes = [2, 32], strides = [1, 1]} : vector<2x128xf32> to vector<2x32xf32>
    %178 = arith.negf %177 : vector<2x32xf32>
    %179 = math.exp %178 : vector<2x32xf32>
    %cst_45 = arith.constant 1.000000e+00 : f32
    %180 = vector.broadcast %cst_45 : f32 to vector<2x32xf32>
    %181 = arith.addf %180, %179 : vector<2x32xf32>
    %182 = arith.divf %180, %181 : vector<2x32xf32>
    %183 = arith.mulf %174, %128 : vector<2x32xf32>
    %184 = arith.mulf %168, %176 : vector<2x32xf32>
    %185 = arith.addf %183, %184 : vector<2x32xf32>
    %186 = math.tanh %185 : vector<2x32xf32>
    %187 = arith.mulf %182, %186 : vector<2x32xf32>
    %188 = vector.extract_strided_slice %8 {offsets = [6, 0], sizes = [2, 128], strides = [1, 1]} : vector<16x128xf32> to vector<2x128xf32>
    %cst_46 = arith.constant dense<0.000000e+00> : vector<2x128xf32>
    %189 = tpu.matmul %158, %0, %cst_46 {dimension_numbers = #tpu.dot_dimension_numbers<[1], [0], [0], [1], [0, 0, 1, 1], [], []>} : vector<2x32xf32>, vector<32x128xf32>, vector<2x128xf32> -> vector<2x128xf32>
    %190 = arith.addf %188, %189 : vector<2x128xf32>
    %191 = vector.extract_strided_slice %190 {offsets = [0, 0], sizes = [2, 32], strides = [1, 1]} : vector<2x128xf32> to vector<2x32xf32>
    %192 = arith.negf %191 : vector<2x32xf32>
    %193 = math.exp %192 : vector<2x32xf32>
    %cst_47 = arith.constant 1.000000e+00 : f32
    %194 = vector.broadcast %cst_47 : f32 to vector<2x32xf32>
    %195 = arith.addf %194, %193 : vector<2x32xf32>
    %196 = arith.divf %194, %195 : vector<2x32xf32>
    %197 = vector.extract_strided_slice %190 {offsets = [0, 32], sizes = [2, 32], strides = [1, 1]} : vector<2x128xf32> to vector<2x32xf32>
    %198 = arith.negf %197 : vector<2x32xf32>
    %199 = math.exp %198 : vector<2x32xf32>
    %cst_48 = arith.constant 1.000000e+00 : f32
    %200 = vector.broadcast %cst_48 : f32 to vector<2x32xf32>
    %201 = arith.addf %200, %199 : vector<2x32xf32>
    %202 = arith.divf %200, %201 : vector<2x32xf32>
    %203 = vector.extract_strided_slice %190 {offsets = [0, 64], sizes = [2, 32], strides = [1, 1]} : vector<2x128xf32> to vector<2x32xf32>
    %204 = math.tanh %203 : vector<2x32xf32>
    %205 = vector.extract_strided_slice %190 {offsets = [0, 96], sizes = [2, 32], strides = [1, 1]} : vector<2x128xf32> to vector<2x32xf32>
    %206 = arith.negf %205 : vector<2x32xf32>
    %207 = math.exp %206 : vector<2x32xf32>
    %cst_49 = arith.constant 1.000000e+00 : f32
    %208 = vector.broadcast %cst_49 : f32 to vector<2x32xf32>
    %209 = arith.addf %208, %207 : vector<2x32xf32>
    %210 = arith.divf %208, %209 : vector<2x32xf32>
    %211 = arith.mulf %202, %156 : vector<2x32xf32>
    %212 = arith.mulf %196, %204 : vector<2x32xf32>
    %213 = arith.addf %211, %212 : vector<2x32xf32>
    %214 = math.tanh %213 : vector<2x32xf32>
    %215 = arith.mulf %210, %214 : vector<2x32xf32>
    %216 = tpu.concatenate %215, %187 in 1 : vector<2x32xf32>, vector<2x32xf32> -> vector<2x64xf32>
    %cst_50 = arith.constant dense<0.000000e+00> : vector<2x128xf32>
    %217 = tpu.matmul %216, %1, %cst_50 {dimension_numbers = #tpu.dot_dimension_numbers<[1], [0], [0], [1], [0, 0, 1, 1], [], []>} : vector<2x64xf32>, vector<64x128xf32>, vector<2x128xf32> -> vector<2x128xf32>
    %218 = vector.broadcast %2 : vector<1x128xf32> to vector<2x128xf32>
    %219 = arith.addf %217, %218 : vector<2x128xf32>
    %220 = vector.extract_strided_slice %219 {offsets = [0, 0], sizes = [2, 32], strides = [1, 1]} : vector<2x128xf32> to vector<2x32xf32>
    %221 = arith.negf %220 : vector<2x32xf32>
    %222 = math.exp %221 : vector<2x32xf32>
    %cst_51 = arith.constant 1.000000e+00 : f32
    %223 = vector.broadcast %cst_51 : f32 to vector<2x32xf32>
    %224 = arith.addf %223, %222 : vector<2x32xf32>
    %225 = arith.divf %223, %224 : vector<2x32xf32>
    %226 = vector.extract_strided_slice %219 {offsets = [0, 32], sizes = [2, 32], strides = [1, 1]} : vector<2x128xf32> to vector<2x32xf32>
    %227 = arith.negf %226 : vector<2x32xf32>
    %228 = math.exp %227 : vector<2x32xf32>
    %cst_52 = arith.constant 1.000000e+00 : f32
    %229 = vector.broadcast %cst_52 : f32 to vector<2x32xf32>
    %230 = arith.addf %229, %228 : vector<2x32xf32>
    %231 = arith.divf %229, %230 : vector<2x32xf32>
    %232 = vector.extract_strided_slice %219 {offsets = [0, 64], sizes = [2, 32], strides = [1, 1]} : vector<2x128xf32> to vector<2x32xf32>
    %233 = math.tanh %232 : vector<2x32xf32>
    %234 = vector.extract_strided_slice %219 {offsets = [0, 96], sizes = [2, 32], strides = [1, 1]} : vector<2x128xf32> to vector<2x32xf32>
    %235 = arith.negf %234 : vector<2x32xf32>
    %236 = math.exp %235 : vector<2x32xf32>
    %cst_53 = arith.constant 1.000000e+00 : f32
    %237 = vector.broadcast %cst_53 : f32 to vector<2x32xf32>
    %238 = arith.addf %237, %236 : vector<2x32xf32>
    %239 = arith.divf %237, %238 : vector<2x32xf32>
    %240 = arith.mulf %231, %185 : vector<2x32xf32>
    %241 = arith.mulf %225, %233 : vector<2x32xf32>
    %242 = arith.addf %240, %241 : vector<2x32xf32>
    %243 = math.tanh %242 : vector<2x32xf32>
    %244 = arith.mulf %239, %243 : vector<2x32xf32>
    %245 = vector.extract_strided_slice %8 {offsets = [8, 0], sizes = [2, 128], strides = [1, 1]} : vector<16x128xf32> to vector<2x128xf32>
    %cst_54 = arith.constant dense<0.000000e+00> : vector<2x128xf32>
    %246 = tpu.matmul %215, %0, %cst_54 {dimension_numbers = #tpu.dot_dimension_numbers<[1], [0], [0], [1], [0, 0, 1, 1], [], []>} : vector<2x32xf32>, vector<32x128xf32>, vector<2x128xf32> -> vector<2x128xf32>
    %247 = arith.addf %245, %246 : vector<2x128xf32>
    %248 = vector.extract_strided_slice %247 {offsets = [0, 0], sizes = [2, 32], strides = [1, 1]} : vector<2x128xf32> to vector<2x32xf32>
    %249 = arith.negf %248 : vector<2x32xf32>
    %250 = math.exp %249 : vector<2x32xf32>
    %cst_55 = arith.constant 1.000000e+00 : f32
    %251 = vector.broadcast %cst_55 : f32 to vector<2x32xf32>
    %252 = arith.addf %251, %250 : vector<2x32xf32>
    %253 = arith.divf %251, %252 : vector<2x32xf32>
    %254 = vector.extract_strided_slice %247 {offsets = [0, 32], sizes = [2, 32], strides = [1, 1]} : vector<2x128xf32> to vector<2x32xf32>
    %255 = arith.negf %254 : vector<2x32xf32>
    %256 = math.exp %255 : vector<2x32xf32>
    %cst_56 = arith.constant 1.000000e+00 : f32
    %257 = vector.broadcast %cst_56 : f32 to vector<2x32xf32>
    %258 = arith.addf %257, %256 : vector<2x32xf32>
    %259 = arith.divf %257, %258 : vector<2x32xf32>
    %260 = vector.extract_strided_slice %247 {offsets = [0, 64], sizes = [2, 32], strides = [1, 1]} : vector<2x128xf32> to vector<2x32xf32>
    %261 = math.tanh %260 : vector<2x32xf32>
    %262 = vector.extract_strided_slice %247 {offsets = [0, 96], sizes = [2, 32], strides = [1, 1]} : vector<2x128xf32> to vector<2x32xf32>
    %263 = arith.negf %262 : vector<2x32xf32>
    %264 = math.exp %263 : vector<2x32xf32>
    %cst_57 = arith.constant 1.000000e+00 : f32
    %265 = vector.broadcast %cst_57 : f32 to vector<2x32xf32>
    %266 = arith.addf %265, %264 : vector<2x32xf32>
    %267 = arith.divf %265, %266 : vector<2x32xf32>
    %268 = arith.mulf %259, %213 : vector<2x32xf32>
    %269 = arith.mulf %253, %261 : vector<2x32xf32>
    %270 = arith.addf %268, %269 : vector<2x32xf32>
    %271 = math.tanh %270 : vector<2x32xf32>
    %272 = arith.mulf %267, %271 : vector<2x32xf32>
    %273 = tpu.concatenate %272, %244 in 1 : vector<2x32xf32>, vector<2x32xf32> -> vector<2x64xf32>
    %cst_58 = arith.constant dense<0.000000e+00> : vector<2x128xf32>
    %274 = tpu.matmul %273, %1, %cst_58 {dimension_numbers = #tpu.dot_dimension_numbers<[1], [0], [0], [1], [0, 0, 1, 1], [], []>} : vector<2x64xf32>, vector<64x128xf32>, vector<2x128xf32> -> vector<2x128xf32>
    %275 = vector.broadcast %2 : vector<1x128xf32> to vector<2x128xf32>
    %276 = arith.addf %274, %275 : vector<2x128xf32>
    %277 = vector.extract_strided_slice %276 {offsets = [0, 0], sizes = [2, 32], strides = [1, 1]} : vector<2x128xf32> to vector<2x32xf32>
    %278 = arith.negf %277 : vector<2x32xf32>
    %279 = math.exp %278 : vector<2x32xf32>
    %cst_59 = arith.constant 1.000000e+00 : f32
    %280 = vector.broadcast %cst_59 : f32 to vector<2x32xf32>
    %281 = arith.addf %280, %279 : vector<2x32xf32>
    %282 = arith.divf %280, %281 : vector<2x32xf32>
    %283 = vector.extract_strided_slice %276 {offsets = [0, 32], sizes = [2, 32], strides = [1, 1]} : vector<2x128xf32> to vector<2x32xf32>
    %284 = arith.negf %283 : vector<2x32xf32>
    %285 = math.exp %284 : vector<2x32xf32>
    %cst_60 = arith.constant 1.000000e+00 : f32
    %286 = vector.broadcast %cst_60 : f32 to vector<2x32xf32>
    %287 = arith.addf %286, %285 : vector<2x32xf32>
    %288 = arith.divf %286, %287 : vector<2x32xf32>
    %289 = vector.extract_strided_slice %276 {offsets = [0, 64], sizes = [2, 32], strides = [1, 1]} : vector<2x128xf32> to vector<2x32xf32>
    %290 = math.tanh %289 : vector<2x32xf32>
    %291 = vector.extract_strided_slice %276 {offsets = [0, 96], sizes = [2, 32], strides = [1, 1]} : vector<2x128xf32> to vector<2x32xf32>
    %292 = arith.negf %291 : vector<2x32xf32>
    %293 = math.exp %292 : vector<2x32xf32>
    %cst_61 = arith.constant 1.000000e+00 : f32
    %294 = vector.broadcast %cst_61 : f32 to vector<2x32xf32>
    %295 = arith.addf %294, %293 : vector<2x32xf32>
    %296 = arith.divf %294, %295 : vector<2x32xf32>
    %297 = arith.mulf %288, %242 : vector<2x32xf32>
    %298 = arith.mulf %282, %290 : vector<2x32xf32>
    %299 = arith.addf %297, %298 : vector<2x32xf32>
    %300 = math.tanh %299 : vector<2x32xf32>
    %301 = arith.mulf %296, %300 : vector<2x32xf32>
    %302 = vector.extract_strided_slice %8 {offsets = [10, 0], sizes = [2, 128], strides = [1, 1]} : vector<16x128xf32> to vector<2x128xf32>
    %cst_62 = arith.constant dense<0.000000e+00> : vector<2x128xf32>
    %303 = tpu.matmul %272, %0, %cst_62 {dimension_numbers = #tpu.dot_dimension_numbers<[1], [0], [0], [1], [0, 0, 1, 1], [], []>} : vector<2x32xf32>, vector<32x128xf32>, vector<2x128xf32> -> vector<2x128xf32>
    %304 = arith.addf %302, %303 : vector<2x128xf32>
    %305 = vector.extract_strided_slice %304 {offsets = [0, 0], sizes = [2, 32], strides = [1, 1]} : vector<2x128xf32> to vector<2x32xf32>
    %306 = arith.negf %305 : vector<2x32xf32>
    %307 = math.exp %306 : vector<2x32xf32>
    %cst_63 = arith.constant 1.000000e+00 : f32
    %308 = vector.broadcast %cst_63 : f32 to vector<2x32xf32>
    %309 = arith.addf %308, %307 : vector<2x32xf32>
    %310 = arith.divf %308, %309 : vector<2x32xf32>
    %311 = vector.extract_strided_slice %304 {offsets = [0, 32], sizes = [2, 32], strides = [1, 1]} : vector<2x128xf32> to vector<2x32xf32>
    %312 = arith.negf %311 : vector<2x32xf32>
    %313 = math.exp %312 : vector<2x32xf32>
    %cst_64 = arith.constant 1.000000e+00 : f32
    %314 = vector.broadcast %cst_64 : f32 to vector<2x32xf32>
    %315 = arith.addf %314, %313 : vector<2x32xf32>
    %316 = arith.divf %314, %315 : vector<2x32xf32>
    %317 = vector.extract_strided_slice %304 {offsets = [0, 64], sizes = [2, 32], strides = [1, 1]} : vector<2x128xf32> to vector<2x32xf32>
    %318 = math.tanh %317 : vector<2x32xf32>
    %319 = vector.extract_strided_slice %304 {offsets = [0, 96], sizes = [2, 32], strides = [1, 1]} : vector<2x128xf32> to vector<2x32xf32>
    %320 = arith.negf %319 : vector<2x32xf32>
    %321 = math.exp %320 : vector<2x32xf32>
    %cst_65 = arith.constant 1.000000e+00 : f32
    %322 = vector.broadcast %cst_65 : f32 to vector<2x32xf32>
    %323 = arith.addf %322, %321 : vector<2x32xf32>
    %324 = arith.divf %322, %323 : vector<2x32xf32>
    %325 = arith.mulf %316, %270 : vector<2x32xf32>
    %326 = arith.mulf %310, %318 : vector<2x32xf32>
    %327 = arith.addf %325, %326 : vector<2x32xf32>
    %328 = math.tanh %327 : vector<2x32xf32>
    %329 = arith.mulf %324, %328 : vector<2x32xf32>
    %330 = tpu.concatenate %329, %301 in 1 : vector<2x32xf32>, vector<2x32xf32> -> vector<2x64xf32>
    %cst_66 = arith.constant dense<0.000000e+00> : vector<2x128xf32>
    %331 = tpu.matmul %330, %1, %cst_66 {dimension_numbers = #tpu.dot_dimension_numbers<[1], [0], [0], [1], [0, 0, 1, 1], [], []>} : vector<2x64xf32>, vector<64x128xf32>, vector<2x128xf32> -> vector<2x128xf32>
    %332 = vector.broadcast %2 : vector<1x128xf32> to vector<2x128xf32>
    %333 = arith.addf %331, %332 : vector<2x128xf32>
    %334 = vector.extract_strided_slice %333 {offsets = [0, 0], sizes = [2, 32], strides = [1, 1]} : vector<2x128xf32> to vector<2x32xf32>
    %335 = arith.negf %334 : vector<2x32xf32>
    %336 = math.exp %335 : vector<2x32xf32>
    %cst_67 = arith.constant 1.000000e+00 : f32
    %337 = vector.broadcast %cst_67 : f32 to vector<2x32xf32>
    %338 = arith.addf %337, %336 : vector<2x32xf32>
    %339 = arith.divf %337, %338 : vector<2x32xf32>
    %340 = vector.extract_strided_slice %333 {offsets = [0, 32], sizes = [2, 32], strides = [1, 1]} : vector<2x128xf32> to vector<2x32xf32>
    %341 = arith.negf %340 : vector<2x32xf32>
    %342 = math.exp %341 : vector<2x32xf32>
    %cst_68 = arith.constant 1.000000e+00 : f32
    %343 = vector.broadcast %cst_68 : f32 to vector<2x32xf32>
    %344 = arith.addf %343, %342 : vector<2x32xf32>
    %345 = arith.divf %343, %344 : vector<2x32xf32>
    %346 = vector.extract_strided_slice %333 {offsets = [0, 64], sizes = [2, 32], strides = [1, 1]} : vector<2x128xf32> to vector<2x32xf32>
    %347 = math.tanh %346 : vector<2x32xf32>
    %348 = vector.extract_strided_slice %333 {offsets = [0, 96], sizes = [2, 32], strides = [1, 1]} : vector<2x128xf32> to vector<2x32xf32>
    %349 = arith.negf %348 : vector<2x32xf32>
    %350 = math.exp %349 : vector<2x32xf32>
    %cst_69 = arith.constant 1.000000e+00 : f32
    %351 = vector.broadcast %cst_69 : f32 to vector<2x32xf32>
    %352 = arith.addf %351, %350 : vector<2x32xf32>
    %353 = arith.divf %351, %352 : vector<2x32xf32>
    %354 = arith.mulf %345, %299 : vector<2x32xf32>
    %355 = arith.mulf %339, %347 : vector<2x32xf32>
    %356 = arith.addf %354, %355 : vector<2x32xf32>
    %357 = math.tanh %356 : vector<2x32xf32>
    %358 = arith.mulf %353, %357 : vector<2x32xf32>
    %359 = vector.extract_strided_slice %8 {offsets = [12, 0], sizes = [2, 128], strides = [1, 1]} : vector<16x128xf32> to vector<2x128xf32>
    %cst_70 = arith.constant dense<0.000000e+00> : vector<2x128xf32>
    %360 = tpu.matmul %329, %0, %cst_70 {dimension_numbers = #tpu.dot_dimension_numbers<[1], [0], [0], [1], [0, 0, 1, 1], [], []>} : vector<2x32xf32>, vector<32x128xf32>, vector<2x128xf32> -> vector<2x128xf32>
    %361 = arith.addf %359, %360 : vector<2x128xf32>
    %362 = vector.extract_strided_slice %361 {offsets = [0, 0], sizes = [2, 32], strides = [1, 1]} : vector<2x128xf32> to vector<2x32xf32>
    %363 = arith.negf %362 : vector<2x32xf32>
    %364 = math.exp %363 : vector<2x32xf32>
    %cst_71 = arith.constant 1.000000e+00 : f32
    %365 = vector.broadcast %cst_71 : f32 to vector<2x32xf32>
    %366 = arith.addf %365, %364 : vector<2x32xf32>
    %367 = arith.divf %365, %366 : vector<2x32xf32>
    %368 = vector.extract_strided_slice %361 {offsets = [0, 32], sizes = [2, 32], strides = [1, 1]} : vector<2x128xf32> to vector<2x32xf32>
    %369 = arith.negf %368 : vector<2x32xf32>
    %370 = math.exp %369 : vector<2x32xf32>
    %cst_72 = arith.constant 1.000000e+00 : f32
    %371 = vector.broadcast %cst_72 : f32 to vector<2x32xf32>
    %372 = arith.addf %371, %370 : vector<2x32xf32>
    %373 = arith.divf %371, %372 : vector<2x32xf32>
    %374 = vector.extract_strided_slice %361 {offsets = [0, 64], sizes = [2, 32], strides = [1, 1]} : vector<2x128xf32> to vector<2x32xf32>
    %375 = math.tanh %374 : vector<2x32xf32>
    %376 = vector.extract_strided_slice %361 {offsets = [0, 96], sizes = [2, 32], strides = [1, 1]} : vector<2x128xf32> to vector<2x32xf32>
    %377 = arith.negf %376 : vector<2x32xf32>
    %378 = math.exp %377 : vector<2x32xf32>
    %cst_73 = arith.constant 1.000000e+00 : f32
    %379 = vector.broadcast %cst_73 : f32 to vector<2x32xf32>
    %380 = arith.addf %379, %378 : vector<2x32xf32>
    %381 = arith.divf %379, %380 : vector<2x32xf32>
    %382 = arith.mulf %373, %327 : vector<2x32xf32>
    %383 = arith.mulf %367, %375 : vector<2x32xf32>
    %384 = arith.addf %382, %383 : vector<2x32xf32>
    %385 = math.tanh %384 : vector<2x32xf32>
    %386 = arith.mulf %381, %385 : vector<2x32xf32>
    %387 = tpu.concatenate %386, %358 in 1 : vector<2x32xf32>, vector<2x32xf32> -> vector<2x64xf32>
    %cst_74 = arith.constant dense<0.000000e+00> : vector<2x128xf32>
    %388 = tpu.matmul %387, %1, %cst_74 {dimension_numbers = #tpu.dot_dimension_numbers<[1], [0], [0], [1], [0, 0, 1, 1], [], []>} : vector<2x64xf32>, vector<64x128xf32>, vector<2x128xf32> -> vector<2x128xf32>
    %389 = vector.broadcast %2 : vector<1x128xf32> to vector<2x128xf32>
    %390 = arith.addf %388, %389 : vector<2x128xf32>
    %391 = vector.extract_strided_slice %390 {offsets = [0, 0], sizes = [2, 32], strides = [1, 1]} : vector<2x128xf32> to vector<2x32xf32>
    %392 = arith.negf %391 : vector<2x32xf32>
    %393 = math.exp %392 : vector<2x32xf32>
    %cst_75 = arith.constant 1.000000e+00 : f32
    %394 = vector.broadcast %cst_75 : f32 to vector<2x32xf32>
    %395 = arith.addf %394, %393 : vector<2x32xf32>
    %396 = arith.divf %394, %395 : vector<2x32xf32>
    %397 = vector.extract_strided_slice %390 {offsets = [0, 32], sizes = [2, 32], strides = [1, 1]} : vector<2x128xf32> to vector<2x32xf32>
    %398 = arith.negf %397 : vector<2x32xf32>
    %399 = math.exp %398 : vector<2x32xf32>
    %cst_76 = arith.constant 1.000000e+00 : f32
    %400 = vector.broadcast %cst_76 : f32 to vector<2x32xf32>
    %401 = arith.addf %400, %399 : vector<2x32xf32>
    %402 = arith.divf %400, %401 : vector<2x32xf32>
    %403 = vector.extract_strided_slice %390 {offsets = [0, 64], sizes = [2, 32], strides = [1, 1]} : vector<2x128xf32> to vector<2x32xf32>
    %404 = math.tanh %403 : vector<2x32xf32>
    %405 = vector.extract_strided_slice %390 {offsets = [0, 96], sizes = [2, 32], strides = [1, 1]} : vector<2x128xf32> to vector<2x32xf32>
    %406 = arith.negf %405 : vector<2x32xf32>
    %407 = math.exp %406 : vector<2x32xf32>
    %cst_77 = arith.constant 1.000000e+00 : f32
    %408 = vector.broadcast %cst_77 : f32 to vector<2x32xf32>
    %409 = arith.addf %408, %407 : vector<2x32xf32>
    %410 = arith.divf %408, %409 : vector<2x32xf32>
    %411 = arith.mulf %402, %356 : vector<2x32xf32>
    %412 = arith.mulf %396, %404 : vector<2x32xf32>
    %413 = arith.addf %411, %412 : vector<2x32xf32>
    %414 = math.tanh %413 : vector<2x32xf32>
    %415 = arith.mulf %410, %414 : vector<2x32xf32>
    %416 = vector.extract_strided_slice %8 {offsets = [14, 0], sizes = [2, 128], strides = [1, 1]} : vector<16x128xf32> to vector<2x128xf32>
    %cst_78 = arith.constant dense<0.000000e+00> : vector<2x128xf32>
    %417 = tpu.matmul %386, %0, %cst_78 {dimension_numbers = #tpu.dot_dimension_numbers<[1], [0], [0], [1], [0, 0, 1, 1], [], []>} : vector<2x32xf32>, vector<32x128xf32>, vector<2x128xf32> -> vector<2x128xf32>
    %418 = arith.addf %416, %417 : vector<2x128xf32>
    %419 = vector.extract_strided_slice %418 {offsets = [0, 0], sizes = [2, 32], strides = [1, 1]} : vector<2x128xf32> to vector<2x32xf32>
    %420 = arith.negf %419 : vector<2x32xf32>
    %421 = math.exp %420 : vector<2x32xf32>
    %cst_79 = arith.constant 1.000000e+00 : f32
    %422 = vector.broadcast %cst_79 : f32 to vector<2x32xf32>
    %423 = arith.addf %422, %421 : vector<2x32xf32>
    %424 = arith.divf %422, %423 : vector<2x32xf32>
    %425 = vector.extract_strided_slice %418 {offsets = [0, 32], sizes = [2, 32], strides = [1, 1]} : vector<2x128xf32> to vector<2x32xf32>
    %426 = arith.negf %425 : vector<2x32xf32>
    %427 = math.exp %426 : vector<2x32xf32>
    %cst_80 = arith.constant 1.000000e+00 : f32
    %428 = vector.broadcast %cst_80 : f32 to vector<2x32xf32>
    %429 = arith.addf %428, %427 : vector<2x32xf32>
    %430 = arith.divf %428, %429 : vector<2x32xf32>
    %431 = vector.extract_strided_slice %418 {offsets = [0, 64], sizes = [2, 32], strides = [1, 1]} : vector<2x128xf32> to vector<2x32xf32>
    %432 = math.tanh %431 : vector<2x32xf32>
    %433 = vector.extract_strided_slice %418 {offsets = [0, 96], sizes = [2, 32], strides = [1, 1]} : vector<2x128xf32> to vector<2x32xf32>
    %434 = arith.negf %433 : vector<2x32xf32>
    %435 = math.exp %434 : vector<2x32xf32>
    %cst_81 = arith.constant 1.000000e+00 : f32
    %436 = vector.broadcast %cst_81 : f32 to vector<2x32xf32>
    %437 = arith.addf %436, %435 : vector<2x32xf32>
    %438 = arith.divf %436, %437 : vector<2x32xf32>
    %439 = arith.mulf %430, %384 : vector<2x32xf32>
    %440 = arith.mulf %424, %432 : vector<2x32xf32>
    %441 = arith.addf %439, %440 : vector<2x32xf32>
    %442 = math.tanh %441 : vector<2x32xf32>
    %443 = arith.mulf %438, %442 : vector<2x32xf32>
    %444 = tpu.concatenate %443, %415 in 1 : vector<2x32xf32>, vector<2x32xf32> -> vector<2x64xf32>
    %cst_82 = arith.constant dense<0.000000e+00> : vector<2x128xf32>
    %445 = tpu.matmul %444, %1, %cst_82 {dimension_numbers = #tpu.dot_dimension_numbers<[1], [0], [0], [1], [0, 0, 1, 1], [], []>} : vector<2x64xf32>, vector<64x128xf32>, vector<2x128xf32> -> vector<2x128xf32>
    %446 = vector.broadcast %2 : vector<1x128xf32> to vector<2x128xf32>
    %447 = arith.addf %445, %446 : vector<2x128xf32>
    %448 = vector.extract_strided_slice %447 {offsets = [0, 0], sizes = [2, 32], strides = [1, 1]} : vector<2x128xf32> to vector<2x32xf32>
    %449 = arith.negf %448 : vector<2x32xf32>
    %450 = math.exp %449 : vector<2x32xf32>
    %cst_83 = arith.constant 1.000000e+00 : f32
    %451 = vector.broadcast %cst_83 : f32 to vector<2x32xf32>
    %452 = arith.addf %451, %450 : vector<2x32xf32>
    %453 = arith.divf %451, %452 : vector<2x32xf32>
    %454 = vector.extract_strided_slice %447 {offsets = [0, 32], sizes = [2, 32], strides = [1, 1]} : vector<2x128xf32> to vector<2x32xf32>
    %455 = arith.negf %454 : vector<2x32xf32>
    %456 = math.exp %455 : vector<2x32xf32>
    %cst_84 = arith.constant 1.000000e+00 : f32
    %457 = vector.broadcast %cst_84 : f32 to vector<2x32xf32>
    %458 = arith.addf %457, %456 : vector<2x32xf32>
    %459 = arith.divf %457, %458 : vector<2x32xf32>
    %460 = vector.extract_strided_slice %447 {offsets = [0, 64], sizes = [2, 32], strides = [1, 1]} : vector<2x128xf32> to vector<2x32xf32>
    %461 = math.tanh %460 : vector<2x32xf32>
    %462 = vector.extract_strided_slice %447 {offsets = [0, 96], sizes = [2, 32], strides = [1, 1]} : vector<2x128xf32> to vector<2x32xf32>
    %463 = arith.negf %462 : vector<2x32xf32>
    %464 = math.exp %463 : vector<2x32xf32>
    %cst_85 = arith.constant 1.000000e+00 : f32
    %465 = vector.broadcast %cst_85 : f32 to vector<2x32xf32>
    %466 = arith.addf %465, %464 : vector<2x32xf32>
    %467 = arith.divf %465, %466 : vector<2x32xf32>
    %468 = arith.mulf %459, %413 : vector<2x32xf32>
    %469 = arith.mulf %453, %461 : vector<2x32xf32>
    %470 = arith.addf %468, %469 : vector<2x32xf32>
    %471 = math.tanh %470 : vector<2x32xf32>
    %472 = arith.mulf %467, %471 : vector<2x32xf32>
    %473 = tpu.concatenate %73, %130, %187, %244, %301, %358, %415, %472 in 0 : vector<2x32xf32>, vector<2x32xf32>, vector<2x32xf32>, vector<2x32xf32>, vector<2x32xf32>, vector<2x32xf32>, vector<2x32xf32>, vector<2x32xf32> -> vector<16x32xf32>
    %c0_86 = arith.constant 0 : index
    %c0_87 = arith.constant 0 : index
    %474 = vector.load %arg9[%c0_86, %c0_87] : memref<16x32xf32, #tpu.memory_space<vmem>>, vector<16x32xf32>
    tpu.vector_store %arg9[%c0_86, %c0_87], %473 {strides = array<i32>} : memref<16x32xf32, #tpu.memory_space<vmem>>, vector<16x32xf32>,
    %c0_88 = arith.constant 0 : index
    %c0_89 = arith.constant 0 : index
    %c0_90 = arith.constant 0 : index
    %475 = vector.load %arg10[%c0_88, %c0_89, %c0_90] : memref<2x2x32xf32, #tpu.memory_space<vmem>>, vector<1x2x32xf32>
    %476 = vector.shape_cast %475 : vector<1x2x32xf32> to vector<2x32xf32>
    %477 = vector.shape_cast %443 : vector<2x32xf32> to vector<1x2x32xf32>
    tpu.vector_store %arg10[%c0_88, %c0_89, %c0_90], %477 {strides = array<i32>} : memref<2x2x32xf32, #tpu.memory_space<vmem>>, vector<1x2x32xf32>,
    %c1_91 = arith.constant 1 : index
    %c0_92 = arith.constant 0 : index
    %c0_93 = arith.constant 0 : index
    %478 = vector.load %arg10[%c1_91, %c0_92, %c0_93] : memref<2x2x32xf32, #tpu.memory_space<vmem>>, vector<1x2x32xf32>
    %479 = vector.shape_cast %478 : vector<1x2x32xf32> to vector<2x32xf32>
    %480 = vector.shape_cast %472 : vector<2x32xf32> to vector<1x2x32xf32>
    tpu.vector_store %arg10[%c1_91, %c0_92, %c0_93], %480 {strides = array<i32>} : memref<2x2x32xf32, #tpu.memory_space<vmem>>, vector<1x2x32xf32>,
    %c0_94 = arith.constant 0 : index
    %c0_95 = arith.constant 0 : index
    %c0_96 = arith.constant 0 : index
    %481 = vector.load %arg11[%c0_94, %c0_95, %c0_96] : memref<2x2x32xf32, #tpu.memory_space<vmem>>, vector<1x2x32xf32>
    %482 = vector.shape_cast %481 : vector<1x2x32xf32> to vector<2x32xf32>
    %483 = vector.shape_cast %441 : vector<2x32xf32> to vector<1x2x32xf32>
    tpu.vector_store %arg11[%c0_94, %c0_95, %c0_96], %483 {strides = array<i32>} : memref<2x2x32xf32, #tpu.memory_space<vmem>>, vector<1x2x32xf32>,
    %c1_97 = arith.constant 1 : index
    %c0_98 = arith.constant 0 : index
    %c0_99 = arith.constant 0 : index
    %484 = vector.load %arg11[%c1_97, %c0_98, %c0_99] : memref<2x2x32xf32, #tpu.memory_space<vmem>>, vector<1x2x32xf32>
    %485 = vector.shape_cast %484 : vector<1x2x32xf32> to vector<2x32xf32>
    %486 = vector.shape_cast %470 : vector<2x32xf32> to vector<1x2x32xf32>
    tpu.vector_store %arg11[%c1_97, %c0_98, %c0_99], %486 {strides = array<i32>} : memref<2x2x32xf32, #tpu.memory_space<vmem>>, vector<1x2x32xf32>,
    return
  }
  func.func @transform_0(%arg0: i32) -> (i32, i32) {
    %c0_i32 = arith.constant 0 : i32
    %c0_i32_0 = arith.constant 0 : i32
    %c0_i32_1 = arith.constant 0 : i32
    return %c0_i32, %c0_i32_0 : i32, i32
  }
  func.func @transform_1(%arg0: i32) -> (i32, i32, i32) {
    %c0_i32 = arith.constant 0 : i32
    %c0_i32_0 = arith.constant 0 : i32
    %c0_i32_1 = arith.constant 0 : i32
    %c0_i32_2 = arith.constant 0 : i32
    return %c0_i32, %c0_i32_0, %c0_i32_1 : i32, i32, i32
  }
  func.func @transform_2(%arg0: i32) -> (i32, i32, i32) {
    %c0_i32 = arith.constant 0 : i32
    %c0_i32_0 = arith.constant 0 : i32
    %c0_i32_1 = arith.constant 0 : i32
    %c0_i32_2 = arith.constant 0 : i32
    return %c0_i32, %c0_i32_0, %c0_i32_1 : i32, i32, i32
  }
  func.func @transform_3(%arg0: i32) -> (i32, i32) {
    %c0_i32 = arith.constant 0 : i32
    %c0_i32_0 = arith.constant 0 : i32
    %c0_i32_1 = arith.constant 0 : i32
    return %c0_i32, %c0_i32_0 : i32, i32
  }
  func.func @transform_4(%arg0: i32) -> (i32, i32) {
    %c0_i32 = arith.constant 0 : i32
    %c0_i32_0 = arith.constant 0 : i32
    %c0_i32_1 = arith.constant 0 : i32
    return %c0_i32, %c0_i32_0 : i32, i32
  }
  func.func @transform_5(%arg0: i32) -> (i32, i32) {
    %c0_i32 = arith.constant 0 : i32
    %c0_i32_0 = arith.constant 0 : i32
    %c0_i32_1 = arith.constant 0 : i32
    return %c0_i32, %c0_i32_0 : i32, i32
  }
  func.func @transform_6(%arg0: i32) -> (i32, i32) {
    %c0_i32 = arith.constant 0 : i32
    %c0_i32_0 = arith.constant 0 : i32
    %c0_i32_1 = arith.constant 0 : i32
    return %c0_i32, %c0_i32_0 : i32, i32
  }
  func.func @transform_7(%arg0: i32) -> (i32, i32) {
    %c0_i32 = arith.constant 0 : i32
    %c0_i32_0 = arith.constant 0 : i32
    %c0_i32_1 = arith.constant 0 : i32
    return %c0_i32, %c0_i32_0 : i32, i32
  }
  func.func @transform_8(%arg0: i32) -> (i32, i32) {
    %c0_i32 = arith.constant 0 : i32
    %c0_i32_0 = arith.constant 0 : i32
    %c0_i32_1 = arith.constant 0 : i32
    return %c0_i32, %c0_i32_0 : i32, i32
  }
  func.func @transform_9(%arg0: i32) -> (i32, i32, i32) {
    %c0_i32 = arith.constant 0 : i32
    %c0_i32_0 = arith.constant 0 : i32
    %c0_i32_1 = arith.constant 0 : i32
    %c0_i32_2 = arith.constant 0 : i32
    return %c0_i32, %c0_i32_0, %c0_i32_1 : i32, i32, i32
  }
  func.func @transform_10(%arg0: i32) -> (i32, i32, i32) {
    %c0_i32 = arith.constant 0 : i32
    %c0_i32_0 = arith.constant 0 : i32
    %c0_i32_1 = arith.constant 0 : i32
    %c0_i32_2 = arith.constant 0 : i32
    return %c0_i32, %c0_i32_0, %c0_i32_1 : i32, i32, i32
  }
}

</mosaic_0001>

<bundles_post_ra>
// kernel: rnn_base_forward.1
= control target key start
LH: loop header
LB: loop body
LE: loop exit
PB: predicated region body
PF: predicated region fallthrough
CT: control target
= control target key end

     0   :  { %16 = vsyncpa [#allocation3], 0  ;;  %vm58_vm0 = vcmask 130048   ;;  %v2568_v5 = vmov 0.0   ;;  %s3198_s0 = inlined_call_operand.vmem [shape: f32[16,16], index: 0, kind: input, shape index: {}]   ;;  %s3199_s1 = inlined_call_operand.vmem [shape: f32[2,2,32], index: 1, kind: input, shape index: {}, may-alias: {1,2}]   ;;  %s3200_s2 = inlined_call_operand.vmem [shape: f32[2,2,32], index: 2, kind: input, shape index: {}, may-alias: {1,2}]   ;;  %s3201_s3 = inlined_call_operand.vmem [shape: f32[16,128], index: 3, kind: input, shape index: {}]   ;;  %s3202_s4 = inlined_call_operand.vmem [shape: f32[32,128], index: 4, kind: input, shape index: {}]   ;;  %s3203_s5 = inlined_call_operand.vmem [shape: f32[1,128], index: 5, kind: input, shape index: {}]   ;;  %s3204_s6 = inlined_call_operand.vmem [shape: f32[64,128], index: 6, kind: input, shape index: {}]   ;;  %s3205_s7 = inlined_call_operand.vmem [shape: f32[1,128], index: 7, kind: input, shape index: {}]   ;;  %s3206_s8 = inlined_call_operand.hbm [shape: f32[16,32], index: 8, kind: output, shape index: {0}]   ;;  %s3207_s9 = inlined_call_operand.hbm [shape: f32[2,2,32], index: 9, kind: output, shape index: {1}]   ;;  %s3208_s10 = inlined_call_operand.hbm [shape: f32[2,2,32], index: 10, kind: output, shape index: {2}]  }
   0x1   :  { %v50_v0 = vld [vmem:[%s3201_s3 + $0x8] sm:$0xff]  ;;  %v49_v1 = vld [vmem:[%s3201_s3] sm:$0xff]  ;;  %v2649_v4 = vld [vmem:[%s3202_s4 + $0x18] sm:$0xff]  ;;  %2142 = vmatprep.subr.mxu1 %v2568_v5 }
   0x2   :  { %v47_v2 = vld [vmem:[%s3198_s0] sm:$0xff]  ;;  %2105 = vmatprep.subr.mxu0 %v50_v0  ;;  %v48_v3 = vld [vmem:[%s3198_s0 + $0x8] sm:$0xff]  ;;  %2143 = vmatpush3.msra.mxu1 %v2649_v4 }
   0x3   :  { %2109 = vmatprep.mubr.msk.f32.mxu0 %vm58_vm0, %v47_v2  ;;  %2106 = vmatpush3.msra.mxu0 %v50_v0 }
   0x4   :  { %2107 = vmatprep.subr.mxu0 %v49_v1 }
   0x5   :  { %17 = vsyncpa [#allocation5], 0  ;;  %2108 = vmatpush3.msra.mxu0 %v49_v1  ;;  %2144 = vmatprep.subr.mxu1 %v2568_v5  ;;  %v2658_v6 = vld [vmem:[%s3202_s4 + $0x10] sm:$0xff]  ;;  %vm2569_vm1 = vmmov 0   ;;  %v2667_v7 = vld [vmem:[%s3202_s4 + $0x8] sm:$0xff]  ;;  %vm146_vm2 = vcmask 261120  }
   0x6   :  { %2110 = vmatmul.mubr.msk.f32.vlgmr.msra.gmra.mxu0 %vm58_vm0, %v48_v3  ;;  %2112 = vmatprep.subr.mxu0 %v2568_v5  ;;  %v2676_v8 = vld [vmem:[%s3202_s4] sm:$0xff]  ;;  %s2570_s11 = smov 64   ;;  %v2714_v30 = vld [vmem:[%s3204_s6 + $0x38] sm:$0xff]  ;;  %v2719_v31 = vld [vmem:[%s3204_s6 + $0x30] sm:$0xff]  ;;  %vm264_vm3 = vcmask 523264   ;;  %vm1866_vm4 = vcmask 1041408  }
   0x7   :  { %2113 = vmatpush3.msra.mxu0 %v2649_v4  ;;  %2120 = vmatprep.mubr.msk.f32.mxu0 %vm2569_vm1, %v2568_v5  ;;  %v140_v9 = vld [vmem:[%s3199_s1] sm:$0x3]  ;;  %v2726_v32 = vld [vmem:[%s3204_s6 + $0x28] sm:$0xff]  ;;  %v2740_v34 = vld [vmem:[%s3204_s6 + $0x18] sm:$0xff]  ;;  %vm1868_vm5 = vcmask 1043456   ;;  %vm1870_vm6 = vcmask 1045504  }
   0x8   :  { %2114 = vmatprep.subr.mxu0 %v2568_v5  ;;  %2145 = vmatpush3.msra.mxu1 %v2658_v6  ;;  %v1951_v10 = vld [vmem:[%s3203_s5] ss:$0 sm:$0xff]  ;;  %s2571_s5 = smov 32   ;;  %v2747_v35 = vld [vmem:[%s3204_s6 + $0x10] sm:$0xff]  ;;  %v2754_v37 = vld [vmem:[%s3204_s6 + $0x8] sm:$0xff]  ;;  %vm1885_vm7 = vcmask 261126  }
   0x9   :  { %2115 = vmatpush3.msra.mxu0 %v2658_v6  ;;  %2146 = vmatprep.subr.mxu1 %v2568_v5  ;;  %v141_v19 = vld [vmem:[%s3200_s2] sm:$0x3]  ;;  %v1954_v38 = vld [vmem:[%s3199_s1 + $0x2] sm:$0x3]  ;;  %vm1891_vm8 = vcmask 254976   ;;  %s2574_s15 = smov [#allocation2]  }
   0xa   :  { %2116 = vmatprep.subr.mxu0 %v2568_v5  ;;  %2147 = vmatpush3.msra.mxu1 %v2667_v7  ;;  %v2733_v33 = vld [vmem:[%s3204_s6 + $0x20] sm:$0xff]  ;;  %s1909_s16 = sshll.u32 %s2574_s15, 4  ;;  %s1910_s16 = int_to_ptr.vmem [resolvable:$true] %s1909_s16 }
   0xb   :  { %2117 = vmatpush3.msra.mxu0 %v2667_v7  ;;  %2148 = vmatprep.subr.mxu1 %v2568_v5  ;;  %v2768_v39 = vld [vmem:[%s3204_s6] sm:$0xff] }
   0xc   :  { %2118 = vmatprep.subr.mxu0 %v2568_v5  ;;  %2149 = vmatpush3.msra.mxu1 %v2676_v8  ;;  %v2807_v45 = vld [vmem:[%s3205_s7] ss:$0 sm:$0xff]  ;;  %v1955_v55 = vld [vmem:[%s3200_s2 + $0x2] sm:$0x3] }
   0xd   :  { %2119 = vmatpush3.msra.mxu0 %v2676_v8  ;;  %2150 = vmatprep.mubr.msk.f32.mxu1 %vm2569_vm1, %v2568_v5 }
   0xe   :  { %2121 = vmatmul.mubr.msk.f32.vlgmr.msra.gmra.mxu0 %vm146_vm2, %v140_v9  ;;  %2123 = vmatprep.subr.mxu0 %v2568_v5 }
   0xf   :  { %2139 = vmatprep.mubr.msk.f32.mxu0 %vm2569_vm1, %v2568_v5  ;;  %2153 = vmatprep.subr.mxu1 %v2568_v5 }
  0x10   :  { %2124 = vmatpush3.msra.mxu0 %v2714_v30 }
  0x11   :  { %2125 = vmatprep.subr.mxu0 %v2568_v5 }
  0x12   :  { %2126 = vmatpush3.msra.mxu0 %v2719_v31 }
  0x13   :  { %2127 = vmatprep.subr.mxu0 %v2568_v5 }
  0x14   :  { %2128 = vmatpush3.msra.mxu0 %v2726_v32 }
  0x15   :  { %2129 = vmatprep.subr.mxu0 %v2568_v5 }
  0x16   :  { %2130 = vmatpush3.msra.mxu0 %v2733_v33 }
  0x17   :  { %2131 = vmatprep.subr.mxu0 %v2568_v5 }
  0x18   :  { %2132 = vmatpush3.msra.mxu0 %v2740_v34 }
  0x19   :  { %2133 = vmatprep.subr.mxu0 %v2568_v5 }
  0x1a   :  { %2134 = vmatpush3.msra.mxu0 %v2747_v35 }
  0x1b   :  { %2135 = vmatprep.subr.mxu0 %v2568_v5 }
  0x1c   :  { %2136 = vmatpush3.msra.mxu0 %v2754_v37 }
  0x1d   :  { %2137 = vmatprep.subr.mxu0 %v2568_v5 }
  0x1e   :  { %2138 = vmatpush3.msra.mxu0 %v2768_v39 }
  0x1f   :  { %2172 = vmatprep.subr.mxu0 %v2568_v5 }
  0xc6   :  { %v2111_v11 = vpop.f32.mrf.mxu0 }
  0xc7   :  { %v2697_v12 = vadd.f32 %v2111_v11, %v1951_v10 }
  0xc8   :  { %v131_v13 = vpop.f32.mrf.mxu0 }
  0xc9   :  { %v2699_v14 = vadd.f32 %v1951_v10, %v131_v13 }
  0xce   :  { %v216_v15 = vpop.f32.mrf.mxu0 }
  0xcf   :  { %v220_v16 = vadd.f32 %v216_v15, %v2699_v14 }
  0xd0   :  { %v2122_v17 = vpop.f32.mrf.mxu0 }
  0xd1   :  { %2363 = vtanh.f32 %v220_v16  ;;  %v1957_v20 = vmul.f32 -1.442695, %v220_v16 }
  0xd3   :  { %2365 = vpow2.f32 %v1957_v20 }
  0xde   :  { %v2364_v18 = vpop.eup %2363 }
  0xdf   :  { %234 = vrot.lane.b32.xlu0 %v2364_v18, %s2570_s11 }
  0xe0   :  { %v2366_v21 = vpop.eup %2365 }
  0xe1   :  { %v224_v22 = vadd.f32 1.0, %v2366_v21 }
  0xe3   :  { %229 = vrot.lane.b32.xlu0 %v141_v19, %s2571_s5  ;;  %2367 = vrcp.f32 %v224_v22 }
  0xf0   :  { %v2368_v23 = vpop.eup %2367 }
 0x151   :  { %v235_v24 = vpop.permute.xlu0 %234 }
 0x152   :  { %v237_v25 = vmul.f32 %v2368_v23, %v235_v24 }
 0x154   :  { %239 = vrot.lane.b32.xlu1 %v237_v25, %s2571_s5 }
 0x155   :  { %v230_v26 = vpop.permute.xlu0 %229 }
 0x156   :  { %v232_v27 = vmul.f32 %v2368_v23, %v230_v26 }
 0x1c6   :  { %v240_v28 = vpop.permute.xlu1 %239 }
 0x1c7   :  { %v2708_v29 = vadd.f32 %v240_v28, %v232_v27 }
 0x1c9   :  { %2369 = vtanh.f32 %v2708_v29  ;;  %v450_v10 = vrot.slane %v2708_v29, 6 }
 0x1d6   :  { %v2370_v36 = vpop.eup %2369 }
 0x1d7   :  { %245 = vrot.lane.b32.xlu1 %v2370_v36, %s2570_s11 }
 0x1db   :  { %254 = vrot.lane.b32.xlu1 %v1954_v38, %s2571_s5 }
 0x249   :  { %v246_v40 = vpop.permute.xlu1 %245 }
 0x24a   :  { %v248_v41 = vmul.f32 %v2368_v23, %v246_v40 }
 0x24c   :  { %250 = vrot.lane.b32.xlu0 %v248_v41, %s2571_s5 }
 0x24d   :  { %v255_v42 = vpop.permute.xlu1 %254 }
 0x2be   :  { %v251_v43 = vpop.permute.xlu0 %250 }
 0x2bf   :  { %v257_v44 = vsel %vm146_vm2, %v251_v43, %v255_v42  ;;  %2151 = vmatmul.mubr.msk.f32.vlgmr.msra.gmra.mxu1 %vm146_vm2, %v251_v43 }
 0x2c0   :  { %2140 = vmatmul.mubr.msk.f32.vlgmr.msra.gmra.mxu0 %vm264_vm3, %v257_v44  ;;  %2154 = vmatpush3.msra.mxu1 %v2714_v30 }
 0x2c1   :  { %2155 = vmatprep.subr.mxu1 %v2568_v5  ;;  %2173 = vmatpush3.msra.mxu0 %v2649_v4 }
 0x2c2   :  { %2156 = vmatpush3.msra.mxu1 %v2719_v31  ;;  %2174 = vmatprep.subr.mxu0 %v2568_v5 }
 0x2c3   :  { %2157 = vmatprep.subr.mxu1 %v2568_v5  ;;  %2175 = vmatpush3.msra.mxu0 %v2658_v6 }
 0x2c4   :  { %2158 = vmatpush3.msra.mxu1 %v2726_v32  ;;  %2176 = vmatprep.subr.mxu0 %v2568_v5 }
 0x2c5   :  { %2159 = vmatprep.subr.mxu1 %v2568_v5  ;;  %2177 = vmatpush3.msra.mxu0 %v2667_v7 }
 0x2c6   :  { %2160 = vmatpush3.msra.mxu1 %v2733_v33  ;;  %2178 = vmatprep.subr.mxu0 %v2568_v5 }
 0x2c7   :  { %2161 = vmatprep.subr.mxu1 %v2568_v5  ;;  %2169 = vmatprep.mubr.msk.f32.mxu1 %vm2569_vm1, %v2568_v5 }
 0x2c8   :  { %2162 = vmatpush3.msra.mxu1 %v2740_v34  ;;  %2179 = vmatpush3.msra.mxu0 %v2676_v8 }
 0x2c9   :  { %2163 = vmatprep.subr.mxu1 %v2568_v5  ;;  %2180 = vmatprep.mubr.msk.f32.mxu0 %vm2569_vm1, %v2568_v5 }
 0x2ca   :  { %2164 = vmatpush3.msra.mxu1 %v2747_v35  ;;  %2183 = vmatprep.subr.mxu0 %v2568_v5 }
 0x2cb   :  { %2165 = vmatprep.subr.mxu1 %v2568_v5 }
 0x2cc   :  { %2166 = vmatpush3.msra.mxu1 %v2754_v37 }
 0x2cd   :  { %2167 = vmatprep.subr.mxu1 %v2568_v5 }
 0x2ce   :  { %2168 = vmatpush3.msra.mxu1 %v2768_v39 }
 0x2cf   :  { %2202 = vmatprep.subr.mxu1 %v2568_v5 }
 0x37f   :  { %v434_v46 = vpop.f32.mrf.mxu1 }
 0x380   :  { %v439_v47 = vrot.slane %v434_v46, 6  ;;  %v334_v48 = vpop.f32.mrf.mxu0 }
 0x381   :  { %v335_v49 = vadd.f32 %v2807_v45, %v334_v48  ;;  %v2152_v50 = vpop.f32.mrf.mxu1 }
 0x382   :  { %v441_v51 = vadd.f32 %v439_v47, %v2699_v14  ;;  %v2141_v52 = vpop.f32.mrf.mxu0 }
 0x383   :  { %2371 = vtanh.f32 %v335_v49  ;;  %v1960_v56 = vmul.f32 -1.442695, %v335_v49 }
 0x384   :  { %2373 = vtanh.f32 %v441_v51  ;;  %v1962_v57 = vmul.f32 -1.442695, %v441_v51 }
 0x385   :  { %2375 = vpow2.f32 %v1960_v56 }
 0x386   :  { %2377 = vpow2.f32 %v1962_v57 }
 0x390   :  { %v2372_v53 = vpop.eup %2371 }
 0x391   :  { %v2374_v54 = vpop.eup %2373  ;;  %351 = vrot.lane.b32.xlu0 %v2372_v53, %s2570_s11 }
 0x392   :  { %454 = vrot.lane.b32.xlu1 %v2374_v54, %s2570_s11  ;;  %v2376_v58 = vpop.eup %2375 }
 0x393   :  { %v2378_v59 = vpop.eup %2377  ;;  %v341_v60 = vadd.f32 1.0, %v2376_v58 }
 0x394   :  { %v445_v61 = vadd.f32 1.0, %v2378_v59 }
 0x395   :  { %346 = vrot.lane.b32.xlu0 %v1955_v55, %s2571_s5  ;;  %2379 = vrcp.f32 %v341_v60 }
 0x396   :  { %2381 = vrcp.f32 %v445_v61 }
 0x3a2   :  { %v2380_v62 = vpop.eup %2379 }
 0x3a3   :  { %v2382_v0 = vpop.eup %2381 }
 0x3a4   :  { %v452_v15 = vmul.f32 %v2382_v0, %v450_v10 }
 0x403   :  { %v352_v63 = vpop.permute.xlu0 %351 }
 0x404   :  { %v354_v1 = vmul.f32 %v2380_v62, %v352_v63  ;;  %v455_v2 = vpop.permute.xlu1 %454 }
 0x405   :  { %v457_v3 = vmul.f32 %v2382_v0, %v455_v2 }
 0x406   :  { %356 = vrot.lane.b32.xlu1 %v354_v1, %s2571_s5 }
 0x407   :  { %459 = vrot.lane.b32.xlu0 %v457_v3, %s2571_s5  ;;  %v347_v9 = vpop.permute.xlu0 %346 }
 0x408   :  { %v349_v11 = vmul.f32 %v2380_v62, %v347_v9 }
 0x478   :  { %v357_v13 = vpop.permute.xlu1 %356 }
 0x479   :  { %v2820_v16 = vadd.f32 %v357_v13, %v349_v11  ;;  %v460_v17 = vpop.permute.xlu0 %459 }
 0x47a   :  { %v2822_v18 = vadd.f32 %v460_v17, %v452_v15 }
 0x47b   :  { %2383 = vtanh.f32 %v2820_v16 }
 0x47c   :  { %2385 = vtanh.f32 %v2822_v18  ;;  %v664_v63 = vrot.slane %v2822_v18, 6 }
 0x488   :  { %v2384_v19 = vpop.eup %2383 }
 0x489   :  { %v2386_v20 = vpop.eup %2385  ;;  %362 = vrot.lane.b32.xlu1 %v2384_v19, %s2570_s11 }
 0x48a   :  { %465 = vrot.lane.b32.xlu0 %v2386_v20, %s2570_s11 }
 0x4fb   :  { %v363_v21 = vpop.permute.xlu1 %362 }
 0x4fc   :  { %v2828_v22 = vmul.f32 %v2380_v62, %v363_v21  ;;  %v466_v23 = vpop.permute.xlu0 %465 }
 0x4fd   :  { %v468_v24 = vmul.f32 %v2382_v0, %v466_v23 }
 0x4fe   :  { %v474_v25 = vrot.slane %v2828_v22, 6 }
 0x4ff   :  { %470 = vrot.lane.b32.xlu1 %v468_v24, %s2571_s5  ;;  %v577_v26 = vrot.slane %v468_v24, 2 }
 0x500   :  { %475 = vrot.lane.b32.xlu0 %v474_v25, %s2570_s11 }
 0x503   :  { %578 = vrot.lane.b32.xlu1 %v577_v26, %s2571_s5 }
 0x571   :  { %v471_v27 = vpop.permute.xlu1 %470 }
 0x572   :  { %v476_v28 = vpop.permute.xlu0 %475 }
 0x573   :  { %v478_v29 = vsel %vm146_vm2, %v471_v27, %v476_v28 }
 0x574   :  { %v480_v36 = vrot.slane %v478_v29, 2 }
 0x575   :  { %v579_v38 = vpop.permute.xlu1 %578 }
 0x576   :  { %2170 = vmatmul.mubr.msk.f32.vlgmr.msra.gmra.mxu1 %vm264_vm3, %v480_v36  ;;  %2181 = vmatmul.mubr.msk.f32.vlgmr.msra.gmra.mxu0 %vm146_vm2, %v579_v38 }
 0x577   :  { %2184 = vmatpush3.msra.mxu0 %v2714_v30  ;;  %2203 = vmatpush3.msra.mxu1 %v2649_v4 }
 0x578   :  { %2185 = vmatprep.subr.mxu0 %v2568_v5  ;;  %2204 = vmatprep.subr.mxu1 %v2568_v5 }
 0x579   :  { %2186 = vmatpush3.msra.mxu0 %v2719_v31  ;;  %2205 = vmatpush3.msra.mxu1 %v2658_v6 }
 0x57a   :  { %2187 = vmatprep.subr.mxu0 %v2568_v5  ;;  %2206 = vmatprep.subr.mxu1 %v2568_v5 }
 0x57b   :  { %2188 = vmatpush3.msra.mxu0 %v2726_v32  ;;  %2207 = vmatpush3.msra.mxu1 %v2667_v7 }
 0x57c   :  { %2189 = vmatprep.subr.mxu0 %v2568_v5  ;;  %2199 = vmatprep.mubr.msk.f32.mxu0 %vm2569_vm1, %v2568_v5 }
 0x57d   :  { %2190 = vmatpush3.msra.mxu0 %v2733_v33  ;;  %2208 = vmatprep.subr.mxu1 %v2568_v5 }
 0x57e   :  { %2191 = vmatprep.subr.mxu0 %v2568_v5  ;;  %2209 = vmatpush3.msra.mxu1 %v2676_v8 }
 0x57f   :  { %2192 = vmatpush3.msra.mxu0 %v2740_v34  ;;  %2210 = vmatprep.mubr.msk.f32.mxu1 %vm2569_vm1, %v2568_v5 }
 0x580   :  { %2193 = vmatprep.subr.mxu0 %v2568_v5  ;;  %2213 = vmatprep.subr.mxu1 %v2568_v5 }
 0x581   :  { %2194 = vmatpush3.msra.mxu0 %v2747_v35 }
 0x582   :  { %2195 = vmatprep.subr.mxu0 %v2568_v5 }
 0x583   :  { %2196 = vmatpush3.msra.mxu0 %v2754_v37 }
 0x584   :  { %2197 = vmatprep.subr.mxu0 %v2568_v5 }
 0x585   :  { %2198 = vmatpush3.msra.mxu0 %v2768_v39 }
 0x586   :  { %2232 = vmatprep.subr.mxu0 %v2568_v5 }
 0x636   :  { %v549_v40 = vpop.f32.mrf.mxu1  ;;  %v648_v41 = vpop.f32.mrf.mxu0 }
 0x637   :  { %v550_v42 = vadd.f32 %v2807_v45, %v549_v40  ;;  %v653_v43 = vrot.slane %v648_v41, 4 }
 0x638   :  { %v2171_v44 = vpop.f32.mrf.mxu1  ;;  %v2182_v46 = vpop.f32.mrf.mxu0 }
 0x639   :  { %2387 = vtanh.f32 %v550_v42  ;;  %v655_v47 = vadd.f32 %v653_v43, %v2699_v14  ;;  %v1964_v50 = vmul.f32 -1.442695, %v550_v42 }
 0x63b   :  { %2389 = vtanh.f32 %v655_v47  ;;  %v1966_v51 = vmul.f32 -1.442695, %v655_v47 }
 0x63c   :  { %2391 = vpow2.f32 %v1964_v50 }
 0x63d   :  { %2393 = vpow2.f32 %v1966_v51 }
 0x646   :  { %v2388_v48 = vpop.eup %2387 }
 0x647   :  { %562 = vrot.lane.b32.xlu0 %v2388_v48, %s2570_s11 }
 0x648   :  { %v2390_v49 = vpop.eup %2389 }
 0x649   :  { %668 = vrot.lane.b32.xlu1 %v2390_v49, %s2570_s11  ;;  %v2392_v52 = vpop.eup %2391 }
 0x64a   :  { %v2394_v53 = vpop.eup %2393  ;;  %v556_v54 = vadd.f32 1.0, %v2392_v52 }
 0x64b   :  { %v659_v55 = vadd.f32 1.0, %v2394_v53 }
 0x64c   :  { %2395 = vrcp.f32 %v556_v54 }
 0x64d   :  { %2397 = vrcp.f32 %v659_v55 }
 0x659   :  { %v2396_v56 = vpop.eup %2395 }
 0x65a   :  { %v2398_v59 = vpop.eup %2397  ;;  %v560_v62 = vmul.f32 %v2396_v56, %v2820_v16 }
 0x65b   :  { %v666_v2 = vmul.f32 %v2398_v59, %v664_v63 }
 0x6b9   :  { %v563_v57 = vpop.permute.xlu0 %562 }
 0x6ba   :  { %v565_v58 = vmul.f32 %v2396_v56, %v563_v57 }
 0x6bb   :  { %v669_v60 = vpop.permute.xlu1 %668 }
 0x6bc   :  { %567 = vrot.lane.b32.xlu0 %v565_v58, %s2571_s5  ;;  %v671_v61 = vmul.f32 %v2398_v59, %v669_v60 }
 0x6be   :  { %673 = vrot.lane.b32.xlu1 %v671_v61, %s2571_s5 }
 0x72e   :  { %v568_v0 = vpop.permute.xlu0 %567 }
 0x72f   :  { %v2873_v1 = vadd.f32 %v568_v0, %v560_v62 }
 0x730   :  { %v674_v3 = vpop.permute.xlu1 %673 }
 0x731   :  { %2399 = vtanh.f32 %v2873_v1  ;;  %v2876_v9 = vadd.f32 %v674_v3, %v666_v2 }
 0x733   :  { %2401 = vtanh.f32 %v2876_v9 }
 0x73e   :  { %v2400_v10 = vpop.eup %2399 }
 0x73f   :  { %573 = vrot.lane.b32.xlu0 %v2400_v10, %s2570_s11 }
 0x740   :  { %v2402_v11 = vpop.eup %2401 }
 0x741   :  { %679 = vrot.lane.b32.xlu1 %v2402_v11, %s2570_s11 }
 0x7b1   :  { %v574_v13 = vpop.permute.xlu0 %573 }
 0x7b2   :  { %v2881_v15 = vmul.f32 %v2396_v56, %v574_v13  ;;  %v878_v56 = vrot.slane %v2876_v9, 6 }
 0x7b3   :  { %v680_v17 = vpop.permute.xlu1 %679 }
 0x7b4   :  { %v688_v16 = vrot.slane %v2881_v15, 4  ;;  %v682_v18 = vmul.f32 %v2398_v59, %v680_v17  ;;  %v1853_v0 = vrot.slane %v2881_v15, 6 }
 0x7b6   :  { %689 = vrot.lane.b32.xlu1 %v688_v16, %s2570_s11  ;;  %684 = vrot.lane.b32.xlu0 %v682_v18, %s2571_s5  ;;  %v791_v19 = vrot.slane %v682_v18, 4  ;;  %v1867_v13 = vsel %vm1866_vm4, %v2828_v22, %v1853_v0 }
 0x7ba   :  { %792 = vrot.lane.b32.xlu0 %v791_v19, %s2571_s5 }
 0x828   :  { %v690_v20 = vpop.permute.xlu1 %689  ;;  %v685_v21 = vpop.permute.xlu0 %684 }
 0x829   :  { %v692_v23 = vsel %vm146_vm2, %v685_v21, %v690_v20 }
 0x82a   :  { %v694_v24 = vrot.slane %v692_v23, 4 }
 0x82c   :  { %v793_v25 = vpop.permute.xlu0 %792  ;;  %2200 = vmatmul.mubr.msk.f32.vlgmr.msra.gmra.mxu0 %vm264_vm3, %v694_v24 }
 0x82d   :  { %2211 = vmatmul.mubr.msk.f32.vlgmr.msra.gmra.mxu1 %vm146_vm2, %v793_v25  ;;  %2233 = vmatpush3.msra.mxu0 %v2649_v4 }
 0x82e   :  { %2214 = vmatpush3.msra.mxu1 %v2714_v30  ;;  %2234 = vmatprep.subr.mxu0 %v2568_v5 }
 0x82f   :  { %2215 = vmatprep.subr.mxu1 %v2568_v5  ;;  %2235 = vmatpush3.msra.mxu0 %v2658_v6 }
 0x830   :  { %2216 = vmatpush3.msra.mxu1 %v2719_v31  ;;  %2236 = vmatprep.subr.mxu0 %v2568_v5 }
 0x831   :  { %2217 = vmatprep.subr.mxu1 %v2568_v5  ;;  %2237 = vmatpush3.msra.mxu0 %v2667_v7 }
 0x832   :  { %2218 = vmatpush3.msra.mxu1 %v2726_v32  ;;  %2229 = vmatprep.mubr.msk.f32.mxu1 %vm2569_vm1, %v2568_v5 }
 0x833   :  { %2219 = vmatprep.subr.mxu1 %v2568_v5  ;;  %2238 = vmatprep.subr.mxu0 %v2568_v5 }
 0x834   :  { %2220 = vmatpush3.msra.mxu1 %v2733_v33  ;;  %2239 = vmatpush3.msra.mxu0 %v2676_v8 }
 0x835   :  { %2221 = vmatprep.subr.mxu1 %v2568_v5  ;;  %2240 = vmatprep.mubr.msk.f32.mxu0 %vm2569_vm1, %v2568_v5 }
 0x836   :  { %2222 = vmatpush3.msra.mxu1 %v2740_v34  ;;  %2243 = vmatprep.subr.mxu0 %v2568_v5 }
 0x837   :  { %2223 = vmatprep.subr.mxu1 %v2568_v5 }
 0x838   :  { %2224 = vmatpush3.msra.mxu1 %v2747_v35 }
 0x839   :  { %2225 = vmatprep.subr.mxu1 %v2568_v5 }
 0x83a   :  { %2226 = vmatpush3.msra.mxu1 %v2754_v37 }
 0x83b   :  { %2227 = vmatprep.subr.mxu1 %v2568_v5 }
 0x83c   :  { %2228 = vmatpush3.msra.mxu1 %v2768_v39 }
 0x83d   :  { %2262 = vmatprep.subr.mxu1 %v2568_v5 }
 0x8ec   :  { %v763_v26 = vpop.f32.mrf.mxu0 }
 0x8ed   :  { %v764_v27 = vadd.f32 %v2807_v45, %v763_v26  ;;  %v862_v28 = vpop.f32.mrf.mxu1 }
 0x8ee   :  { %v867_v29 = vrot.slane %v862_v28, 2  ;;  %v2201_v36 = vpop.f32.mrf.mxu0 }
 0x8ef   :  { %2403 = vtanh.f32 %v764_v27  ;;  %v2212_v38 = vpop.f32.mrf.mxu1  ;;  %v1968_v43 = vmul.f32 -1.442695, %v764_v27 }
 0x8f0   :  { %v869_v40 = vadd.f32 %v867_v29, %v2699_v14 }
 0x8f2   :  { %2405 = vtanh.f32 %v869_v40  ;;  %v1970_v44 = vmul.f32 -1.442695, %v869_v40 }
 0x8f3   :  { %2407 = vpow2.f32 %v1968_v43 }
 0x8f4   :  { %2409 = vpow2.f32 %v1970_v44 }
 0x8fc   :  { %v2404_v41 = vpop.eup %2403 }
 0x8fd   :  { %776 = vrot.lane.b32.xlu1 %v2404_v41, %s2570_s11 }
 0x8ff   :  { %v2406_v42 = vpop.eup %2405 }
 0x900   :  { %882 = vrot.lane.b32.xlu0 %v2406_v42, %s2570_s11  ;;  %v2408_v46 = vpop.eup %2407 }
 0x901   :  { %v2410_v47 = vpop.eup %2409  ;;  %v770_v48 = vadd.f32 1.0, %v2408_v46 }
 0x902   :  { %v873_v49 = vadd.f32 1.0, %v2410_v47 }
 0x903   :  { %2411 = vrcp.f32 %v770_v48 }
 0x904   :  { %2413 = vrcp.f32 %v873_v49 }
 0x910   :  { %v2412_v50 = vpop.eup %2411 }
 0x911   :  { %v2414_v52 = vpop.eup %2413  ;;  %v774_v55 = vmul.f32 %v2412_v50, %v2873_v1 }
 0x912   :  { %v880_v59 = vmul.f32 %v2414_v52, %v878_v56 }
 0x96f   :  { %v777_v51 = vpop.permute.xlu1 %776 }
 0x970   :  { %v779_v14 = vmul.f32 %v2412_v50, %v777_v51 }
 0x972   :  { %v883_v53 = vpop.permute.xlu0 %882  ;;  %781 = vrot.lane.b32.xlu1 %v779_v14, %s2571_s5 }
 0x973   :  { %v885_v54 = vmul.f32 %v2414_v52, %v883_v53 }
 0x975   :  { %887 = vrot.lane.b32.xlu0 %v885_v54, %s2571_s5 }
 0x9e4   :  { %v782_v57 = vpop.permute.xlu1 %781 }
 0x9e5   :  { %v2926_v58 = vadd.f32 %v782_v57, %v774_v55 }
 0x9e7   :  { %2415 = vtanh.f32 %v2926_v58  ;;  %v888_v60 = vpop.permute.xlu0 %887 }
 0x9e8   :  { %v2929_v61 = vadd.f32 %v888_v60, %v880_v59 }
 0x9ea   :  { %2417 = vtanh.f32 %v2929_v61  ;;  %v1089_v51 = vrot.slane %v2929_v61, 6 }
 0x9f4   :  { %v2416_v62 = vpop.eup %2415 }
 0x9f5   :  { %787 = vrot.lane.b32.xlu1 %v2416_v62, %s2570_s11 }
 0x9f7   :  { %v2418_v63 = vpop.eup %2417 }
 0x9f8   :  { %893 = vrot.lane.b32.xlu0 %v2418_v63, %s2570_s11 }
 0xa67   :  { %v788_v1 = vpop.permute.xlu1 %787 }
 0xa68   :  { %v790_v2 = vmul.f32 %v2412_v50, %v788_v1 }
 0xa6a   :  { %v902_v3 = vrot.slane %v790_v2, 2  ;;  %v1855_v9 = vrot.slane %v790_v2, 4  ;;  %v894_v10 = vpop.permute.xlu0 %893 }
 0xa6b   :  { %v896_v11 = vmul.f32 %v2414_v52, %v894_v10 }
 0xa6c   :  { %903 = vrot.lane.b32.xlu0 %v902_v3, %s2570_s11  ;;  %v2939_v16 = vsel %vm1868_vm5, %v1867_v13, %v1855_v9 }
 0xa6d   :  { %898 = vrot.lane.b32.xlu1 %v896_v11, %s2571_s5  ;;  %v1005_v17 = vrot.slane %v896_v11, 6 }
 0xa71   :  { %1006 = vrot.lane.b32.xlu1 %v1005_v17, %s2571_s5 }
 0xade   :  { %v904_v15 = vpop.permute.xlu0 %903 }
 0xadf   :  { %v899_v18 = vpop.permute.xlu1 %898 }
 0xae0   :  { %v906_v19 = vsel %vm146_vm2, %v899_v18, %v904_v15 }
 0xae1   :  { %v908_v20 = vrot.slane %v906_v19, 6 }
 0xae3   :  { %2230 = vmatmul.mubr.msk.f32.vlgmr.msra.gmra.mxu1 %vm264_vm3, %v908_v20  ;;  %v1007_v21 = vpop.permute.xlu1 %1006 }
 0xae4   :  { %2241 = vmatmul.mubr.msk.f32.vlgmr.msra.gmra.mxu0 %vm146_vm2, %v1007_v21  ;;  %2263 = vmatpush3.msra.mxu1 %v2649_v4 }
 0xae5   :  { %2244 = vmatpush3.msra.mxu0 %v2714_v30  ;;  %2264 = vmatprep.subr.mxu1 %v2568_v5 }
 0xae6   :  { %2245 = vmatprep.subr.mxu0 %v2568_v5  ;;  %2265 = vmatpush3.msra.mxu1 %v2658_v6 }
 0xae7   :  { %2246 = vmatpush3.msra.mxu0 %v2719_v31  ;;  %2266 = vmatprep.subr.mxu1 %v2568_v5 }
 0xae8   :  { %2247 = vmatprep.subr.mxu0 %v2568_v5  ;;  %2267 = vmatpush3.msra.mxu1 %v2667_v7 }
 0xae9   :  { %2248 = vmatpush3.msra.mxu0 %v2726_v32  ;;  %2268 = vmatprep.subr.mxu1 %v2568_v5 }
 0xaea   :  { %2249 = vmatprep.subr.mxu0 %v2568_v5  ;;  %2269 = vmatpush3.msra.mxu1 %v2676_v8 }
 0xaeb   :  { %2250 = vmatpush3.msra.mxu0 %v2733_v33  ;;  %2270 = vmatprep.mubr.msk.f32.mxu1 %vm2569_vm1, %v2568_v5 }
 0xaec   :  { %2251 = vmatprep.subr.mxu0 %v2568_v5  ;;  %2259 = vmatprep.mubr.msk.f32.mxu0 %vm2569_vm1, %v2568_v5 }
 0xaed   :  { %2252 = vmatpush3.msra.mxu0 %v2740_v34  ;;  %2273 = vmatprep.subr.mxu1 %v2568_v5 }
 0xaee   :  { %2253 = vmatprep.subr.mxu0 %v2568_v5 }
 0xaef   :  { %2254 = vmatpush3.msra.mxu0 %v2747_v35 }
 0xaf0   :  { %2255 = vmatprep.subr.mxu0 %v2568_v5 }
 0xaf1   :  { %2256 = vmatpush3.msra.mxu0 %v2754_v37 }
 0xaf2   :  { %2257 = vmatprep.subr.mxu0 %v2568_v5 }
 0xaf3   :  { %2258 = vmatpush3.msra.mxu0 %v2768_v39 }
 0xaf4   :  { %2292 = vmatprep.subr.mxu0 %v2568_v5 }
 0xba3   :  { %v977_v22 = vpop.f32.mrf.mxu1 }
 0xba4   :  { %v978_v23 = vadd.f32 %v2807_v45, %v977_v22  ;;  %v1076_v24 = vpop.f32.mrf.mxu0 }
 0xba5   :  { %v1080_v25 = vadd.f32 %v1076_v24, %v2697_v12  ;;  %v2231_v26 = vpop.f32.mrf.mxu1 }
 0xba6   :  { %2419 = vtanh.f32 %v978_v23  ;;  %v2242_v27 = vpop.f32.mrf.mxu0  ;;  %v1972_v36 = vmul.f32 -1.442695, %v978_v23 }
 0xba7   :  { %2421 = vtanh.f32 %v1080_v25  ;;  %v1974_v38 = vmul.f32 -1.442695, %v1080_v25 }
 0xba8   :  { %2423 = vpow2.f32 %v1972_v36 }
 0xba9   :  { %2425 = vpow2.f32 %v1974_v38 }
 0xbb3   :  { %v2420_v28 = vpop.eup %2419 }
 0xbb4   :  { %v2422_v29 = vpop.eup %2421  ;;  %990 = vrot.lane.b32.xlu0 %v2420_v28, %s2570_s11 }
 0xbb5   :  { %1093 = vrot.lane.b32.xlu1 %v2422_v29, %s2570_s11  ;;  %v2424_v40 = vpop.eup %2423 }
 0xbb6   :  { %v2426_v41 = vpop.eup %2425  ;;  %v984_v42 = vadd.f32 1.0, %v2424_v40 }
 0xbb7   :  { %v1084_v43 = vadd.f32 1.0, %v2426_v41 }
 0xbb8   :  { %2427 = vrcp.f32 %v984_v42 }
 0xbb9   :  { %2429 = vrcp.f32 %v1084_v43 }
 0xbc5   :  { %v2428_v44 = vpop.eup %2427 }
 0xbc6   :  { %v2430_v47 = vpop.eup %2429  ;;  %v988_v14 = vmul.f32 %v2428_v44, %v2926_v58 }
 0xbc7   :  { %v1091_v53 = vmul.f32 %v2430_v47, %v1089_v51 }
 0xc26   :  { %v991_v46 = vpop.permute.xlu0 %990 }
 0xc27   :  { %v993_v48 = vmul.f32 %v2428_v44, %v991_v46  ;;  %v1094_v49 = vpop.permute.xlu1 %1093 }
 0xc28   :  { %v1096_v50 = vmul.f32 %v2430_v47, %v1094_v49 }
 0xc29   :  { %995 = vrot.lane.b32.xlu0 %v993_v48, %s2571_s5 }
 0xc2a   :  { %1098 = vrot.lane.b32.xlu1 %v1096_v50, %s2571_s5 }
 0xc9b   :  { %v996_v52 = vpop.permute.xlu0 %995 }
 0xc9c   :  { %v2982_v54 = vadd.f32 %v996_v52, %v988_v14  ;;  %v1099_v55 = vpop.permute.xlu1 %1098 }
 0xc9d   :  { %v2984_v56 = vadd.f32 %v1099_v55, %v1091_v53 }
 0xc9e   :  { %2431 = vtanh.f32 %v2982_v54 }
 0xc9f   :  { %2433 = vtanh.f32 %v2984_v56  ;;  %v1298_v28 = vrot.slane %v2984_v56, 6  ;;  %v2491_v56 = vld [vmem:[%s3202_s4 + $0x18] sm:$0xff] }
 0xcab   :  { %v2432_v57 = vpop.eup %2431 }
 0xcac   :  { %v2434_v59 = vpop.eup %2433  ;;  %1001 = vrot.lane.b32.xlu0 %v2432_v57, %s2570_s11  ;;  %v2492_v57 = vld [vmem:[%s3202_s4 + $0x10] sm:$0xff] }
 0xcad   :  { %1104 = vrot.lane.b32.xlu1 %v2434_v59, %s2570_s11 }
 0xd1e   :  { %v1002_v60 = vpop.permute.xlu0 %1001 }
 0xd1f   :  { %v1004_v61 = vmul.f32 %v2428_v44, %v1002_v60  ;;  %v1105_v58 = vpop.permute.xlu1 %1104 }
 0xd20   :  { %v1107_v62 = vmul.f32 %v2430_v47, %v1105_v58 }
 0xd21   :  { %v1857_v63 = vrot.slane %v1004_v61, 2  ;;  %1113 = vrot.lane.b32.xlu1 %v1004_v61, %s2570_s11 }
 0xd22   :  { %1109 = vrot.lane.b32.xlu0 %v1107_v62, %s2571_s5 }
 0xd23   :  { %v2994_v0 = vsel %vm1870_vm6, %v2939_v16, %v1857_v63 }
 0xd93   :  { %v1114_v1 = vpop.permute.xlu1 %1113 }
 0xd94   :  { %v1110_v2 = vpop.permute.xlu0 %1109 }
 0xd95   :  { %v1116_v3 = vsel %vm146_vm2, %v1110_v2, %v1114_v1  ;;  %2271 = vmatmul.mubr.msk.f32.vlgmr.msra.gmra.mxu1 %vm146_vm2, %v1110_v2 }
 0xd96   :  { %2260 = vmatmul.mubr.msk.f32.vlgmr.msra.gmra.mxu0 %vm264_vm3, %v1116_v3  ;;  %2274 = vmatpush3.msra.mxu1 %v2714_v30 }
 0xd97   :  { %2275 = vmatprep.subr.mxu1 %v2568_v5  ;;  %2293 = vmatpush3.msra.mxu0 %v2649_v4 }
 0xd98   :  { %2276 = vmatpush3.msra.mxu1 %v2719_v31  ;;  %2294 = vmatprep.subr.mxu0 %v2568_v5 }
 0xd99   :  { %2277 = vmatprep.subr.mxu1 %v2568_v5  ;;  %2295 = vmatpush3.msra.mxu0 %v2658_v6 }
 0xd9a   :  { %2278 = vmatpush3.msra.mxu1 %v2726_v32  ;;  %2296 = vmatprep.subr.mxu0 %v2568_v5 }
 0xd9b   :  { %2279 = vmatprep.subr.mxu1 %v2568_v5  ;;  %2297 = vmatpush3.msra.mxu0 %v2667_v7 }
 0xd9c   :  { %2280 = vmatpush3.msra.mxu1 %v2733_v33  ;;  %2298 = vmatprep.subr.mxu0 %v2568_v5 }
 0xd9d   :  { %2281 = vmatprep.subr.mxu1 %v2568_v5  ;;  %2289 = vmatprep.mubr.msk.f32.mxu1 %vm2569_vm1, %v2568_v5 }
 0xd9e   :  { %2282 = vmatpush3.msra.mxu1 %v2740_v34  ;;  %2299 = vmatpush3.msra.mxu0 %v2676_v8 }
 0xd9f   :  { %2283 = vmatprep.subr.mxu1 %v2568_v5  ;;  %2300 = vmatprep.mubr.msk.f32.mxu0 %vm2569_vm1, %v2568_v5 }
 0xda0   :  { %2284 = vmatpush3.msra.mxu1 %v2747_v35  ;;  %2303 = vmatprep.subr.mxu0 %v2568_v5 }
 0xda1   :  { %2285 = vmatprep.subr.mxu1 %v2568_v5 }
 0xda2   :  { %2286 = vmatpush3.msra.mxu1 %v2754_v37 }
 0xda3   :  { %2287 = vmatprep.subr.mxu1 %v2568_v5 }
 0xda4   :  { %2288 = vmatpush3.msra.mxu1 %v2768_v39 }
 0xda5   :  { %2322 = vmatprep.subr.mxu1 %v2568_v5 }
 0xe55   :  { %v1282_v4 = vpop.f32.mrf.mxu1 }
 0xe56   :  { %v1287_v6 = vrot.slane %v1282_v4, 6  ;;  %v1186_v7 = vpop.f32.mrf.mxu0 }
 0xe57   :  { %v1187_v8 = vadd.f32 %v2807_v45, %v1186_v7  ;;  %v2272_v9 = vpop.f32.mrf.mxu1 }
 0xe58   :  { %v1289_v10 = vadd.f32 %v1287_v6, %v2697_v12  ;;  %v2261_v11 = vpop.f32.mrf.mxu0 }
 0xe59   :  { %2435 = vtanh.f32 %v1187_v8  ;;  %v1976_v17 = vmul.f32 -1.442695, %v1187_v8 }
 0xe5a   :  { %2437 = vtanh.f32 %v1289_v10  ;;  %v1978_v15 = vmul.f32 -1.442695, %v1289_v10 }
 0xe5b   :  { %2439 = vpow2.f32 %v1976_v17 }
 0xe5c   :  { %2441 = vpow2.f32 %v1978_v15 }
 0xe66   :  { %v2436_v13 = vpop.eup %2435 }
 0xe67   :  { %v2438_v16 = vpop.eup %2437  ;;  %1199 = vrot.lane.b32.xlu0 %v2436_v13, %s2570_s11 }
 0xe68   :  { %1302 = vrot.lane.b32.xlu1 %v2438_v16, %s2570_s11  ;;  %v2440_v18 = vpop.eup %2439 }
 0xe69   :  { %v2442_v19 = vpop.eup %2441  ;;  %v1193_v20 = vadd.f32 1.0, %v2440_v18 }
 0xe6a   :  { %v1293_v21 = vadd.f32 1.0, %v2442_v19 }
 0xe6b   :  { %2443 = vrcp.f32 %v1193_v20 }
 0xe6c   :  { %2445 = vrcp.f32 %v1293_v21 }
 0xe78   :  { %v2444_v22 = vpop.eup %2443 }
 0xe79   :  { %v2446_v24 = vpop.eup %2445  ;;  %v1197_v29 = vmul.f32 %v2444_v22, %v2982_v54 }
 0xe7a   :  { %v1300_v38 = vmul.f32 %v2446_v24, %v1298_v28 }
 0xed9   :  { %v1200_v23 = vpop.permute.xlu0 %1199 }
 0xeda   :  { %v1202_v25 = vmul.f32 %v2444_v22, %v1200_v23  ;;  %v1303_v26 = vpop.permute.xlu1 %1302 }
 0xedb   :  { %v1305_v27 = vmul.f32 %v2446_v24, %v1303_v26 }
 0xedc   :  { %1204 = vrot.lane.b32.xlu0 %v1202_v25, %s2571_s5 }
 0xedd   :  { %1307 = vrot.lane.b32.xlu1 %v1305_v27, %s2571_s5 }
 0xf4e   :  { %v1205_v36 = vpop.permute.xlu0 %1204 }
 0xf4f   :  { %v3035_v40 = vadd.f32 %v1205_v36, %v1197_v29  ;;  %v1308_v41 = vpop.permute.xlu1 %1307 }
 0xf50   :  { %v3037_v42 = vadd.f32 %v1308_v41, %v1300_v38  ;;  %v2496_v41 = vld [vmem:[%s3204_s6 + $0x30] sm:$0xff] }
 0xf51   :  { %2447 = vtanh.f32 %v3035_v40 }
 0xf52   :  { %2449 = vtanh.f32 %v3037_v42  ;;  %v1512_v11 = vrot.slane %v3037_v42, 6  ;;  %v2497_v42 = vld [vmem:[%s3204_s6 + $0x28] sm:$0xff] }
 0xf5e   :  { %v2448_v43 = vpop.eup %2447 }
 0xf5f   :  { %v2450_v44 = vpop.eup %2449  ;;  %1210 = vrot.lane.b32.xlu0 %v2448_v43, %s2570_s11  ;;  %v2498_v43 = vld [vmem:[%s3204_s6 + $0x20] sm:$0xff] }
 0xf60   :  { %1313 = vrot.lane.b32.xlu1 %v2450_v44, %s2570_s11  ;;  %v2499_v44 = vld [vmem:[%s3204_s6 + $0x18] sm:$0xff] }
 0xfd1   :  { %v1211_v46 = vpop.permute.xlu0 %1210 }
 0xfd2   :  { %v3043_v47 = vmul.f32 %v2444_v22, %v1211_v46  ;;  %v1314_v48 = vpop.permute.xlu1 %1313  ;;  %v2500_v46 = vld [vmem:[%s3204_s6 + $0x10] sm:$0xff] }
 0xfd3   :  { %v1316_v49 = vmul.f32 %v2446_v24, %v1314_v48  ;;  %v2501_v48 = vld [vmem:[%s3204_s6 + $0x8] sm:$0xff] }
 0xfd4   :  { %v1322_v50 = vrot.slane %v3043_v47, 6 }
 0xfd5   :  { %1318 = vrot.lane.b32.xlu0 %v1316_v49, %s2571_s5  ;;  %v1425_v51 = vrot.slane %v1316_v49, 2  ;;  %v2502_v49 = vld [vmem:[%s3204_s6] sm:$0xff] }
 0xfd6   :  { %1323 = vrot.lane.b32.xlu1 %v1322_v50, %s2570_s11 }
 0xfd9   :  { %1426 = vrot.lane.b32.xlu0 %v1425_v51, %s2571_s5  ;;  %v3148_v51 = vld [vmem:[%s3205_s7] ss:$0 sm:$0xff]  ;;  %s2573_s7 = smov [#allocation4]  }
0x1047   :  { %v1319_v14 = vpop.permute.xlu0 %1318 }
0x1048   :  { %v1324_v52 = vpop.permute.xlu1 %1323 }
0x1049   :  { %v1326_v53 = vsel %vm146_vm2, %v1319_v14, %v1324_v52 }
0x104a   :  { %v1328_v54 = vrot.slane %v1326_v53, 2 }
0x104b   :  { %v1427_v55 = vpop.permute.xlu0 %1426 }
0x104c   :  { %2290 = vmatmul.mubr.msk.f32.vlgmr.msra.gmra.mxu1 %vm264_vm3, %v1328_v54  ;;  %2301 = vmatmul.mubr.msk.f32.vlgmr.msra.gmra.mxu0 %vm146_vm2, %v1427_v55 }
0x104d   :  { %2304 = vmatpush3.msra.mxu0 %v2714_v30  ;;  %2323 = vmatpush3.msra.mxu1 %v2491_v56  ;;  %v2493_v30 = vld [vmem:[%s3202_s4 + $0x8] sm:$0xff] }
0x104e   :  { %2305 = vmatprep.subr.mxu0 %v2568_v5  ;;  %2324 = vmatprep.subr.mxu1 %v2568_v5 }
0x104f   :  { %2306 = vmatpush3.msra.mxu0 %v2719_v31  ;;  %2325 = vmatpush3.msra.mxu1 %v2492_v57  ;;  %v2494_v31 = vld [vmem:[%s3202_s4] sm:$0xff] }
0x1050   :  { %2307 = vmatprep.subr.mxu0 %v2568_v5  ;;  %2326 = vmatprep.subr.mxu1 %v2568_v5 }
0x1051   :  { %2308 = vmatpush3.msra.mxu0 %v2726_v32  ;;  %2327 = vmatpush3.msra.mxu1 %v2493_v30 }
0x1052   :  { %2309 = vmatprep.subr.mxu0 %v2568_v5  ;;  %2319 = vmatprep.mubr.msk.f32.mxu0 %vm2569_vm1, %v2568_v5 }
0x1053   :  { %2310 = vmatpush3.msra.mxu0 %v2733_v33  ;;  %2328 = vmatprep.subr.mxu1 %v2568_v5 }
0x1054   :  { %2311 = vmatprep.subr.mxu0 %v2568_v5  ;;  %2329 = vmatpush3.msra.mxu1 %v2494_v31 }
0x1055   :  { %2312 = vmatpush3.msra.mxu0 %v2740_v34  ;;  %2330 = vmatprep.mubr.msk.f32.mxu1 %vm2569_vm1, %v2568_v5 }
0x1056   :  { %2313 = vmatprep.subr.mxu0 %v2568_v5  ;;  %2333 = vmatprep.subr.mxu1 %v2568_v5 }
0x1057   :  { %2314 = vmatpush3.msra.mxu0 %v2747_v35 }
0x1058   :  { %2315 = vmatprep.subr.mxu0 %v2568_v5 }
0x1059   :  { %2316 = vmatpush3.msra.mxu0 %v2754_v37 }
0x105a   :  { %2317 = vmatprep.subr.mxu0 %v2568_v5 }
0x105b   :  { %2318 = vmatpush3.msra.mxu0 %v2768_v39 }
0x110c   :  { %v1397_v32 = vpop.f32.mrf.mxu1  ;;  %v1496_v33 = vpop.f32.mrf.mxu0 }
0x110d   :  { %v1398_v34 = vadd.f32 %v2807_v45, %v1397_v32  ;;  %v1501_v59 = vrot.slane %v1496_v33, 4 }
0x110e   :  { %v2291_v60 = vpop.f32.mrf.mxu1  ;;  %v2302_v61 = vpop.f32.mrf.mxu0 }
0x110f   :  { %2451 = vtanh.f32 %v1398_v34  ;;  %v1503_v58 = vadd.f32 %v1501_v59, %v2697_v12  ;;  %v1980_v37 = vmul.f32 -1.442695, %v1398_v34 }
0x1111   :  { %2453 = vtanh.f32 %v1503_v58  ;;  %v1982_v63 = vmul.f32 -1.442695, %v1503_v58 }
0x1112   :  { %2455 = vpow2.f32 %v1980_v37 }
0x1113   :  { %2457 = vpow2.f32 %v1982_v63 }
0x111c   :  { %v2452_v35 = vpop.eup %2451 }
0x111d   :  { %1410 = vrot.lane.b32.xlu1 %v2452_v35, %s2570_s11 }
0x111e   :  { %v2454_v62 = vpop.eup %2453 }
0x111f   :  { %1516 = vrot.lane.b32.xlu0 %v2454_v62, %s2570_s11  ;;  %v2456_v39 = vpop.eup %2455 }
0x1120   :  { %v2458_v1 = vpop.eup %2457  ;;  %v1404_v45 = vadd.f32 1.0, %v2456_v39 }
0x1121   :  { %v1507_v2 = vadd.f32 1.0, %v2458_v1 }
0x1122   :  { %2459 = vrcp.f32 %v1404_v45 }
0x1123   :  { %2461 = vrcp.f32 %v1507_v2 }
0x112f   :  { %v2460_v3 = vpop.eup %2459 }
0x1130   :  { %v2462_v7 = vpop.eup %2461  ;;  %v1408_v10 = vmul.f32 %v2460_v3, %v3035_v40  ;;  %v2495_v40 = vld [vmem:[%s3204_s6 + $0x38] sm:$0xff]  ;;  %s2572_s6 = smov 96  }
0x1131   :  { %v1514_v17 = vmul.f32 %v2462_v7, %v1512_v11 }
0x118f   :  { %v1411_v4 = vpop.permute.xlu1 %1410 }
0x1190   :  { %v1413_v6 = vmul.f32 %v2460_v3, %v1411_v4 }
0x1191   :  { %v1517_v8 = vpop.permute.xlu0 %1516 }
0x1192   :  { %1415 = vrot.lane.b32.xlu1 %v1413_v6, %s2571_s5  ;;  %v1519_v9 = vmul.f32 %v2462_v7, %v1517_v8 }
0x1194   :  { %1521 = vrot.lane.b32.xlu0 %v1519_v9, %s2571_s5 }
0x1204   :  { %v1416_v13 = vpop.permute.xlu1 %1415 }
0x1205   :  { %v3095_v16 = vadd.f32 %v1416_v13, %v1408_v10 }
0x1206   :  { %v1522_v15 = vpop.permute.xlu0 %1521 }
0x1207   :  { %2463 = vtanh.f32 %v3095_v16  ;;  %v3098_v18 = vadd.f32 %v1522_v15, %v1514_v17 }
0x1209   :  { %2465 = vtanh.f32 %v3098_v18  ;;  %v1726_v63 = vrot.slane %v3098_v18, 6 }
0x1214   :  { %v2464_v19 = vpop.eup %2463 }
0x1215   :  { %1421 = vrot.lane.b32.xlu1 %v2464_v19, %s2570_s11 }
0x1216   :  { %v2466_v20 = vpop.eup %2465 }
0x1217   :  { %1527 = vrot.lane.b32.xlu0 %v2466_v20, %s2570_s11 }
0x1287   :  { %v1422_v21 = vpop.permute.xlu1 %1421 }
0x1288   :  { %v3103_v22 = vmul.f32 %v2460_v3, %v1422_v21 }
0x1289   :  { %v1528_v24 = vpop.permute.xlu0 %1527 }
0x128a   :  { %v1536_v23 = vrot.slane %v3103_v22, 4  ;;  %v1530_v25 = vmul.f32 %v2462_v7, %v1528_v24  ;;  %v1859_v7 = vrot.slane %v3103_v22, 6 }
0x128c   :  { %1537 = vrot.lane.b32.xlu0 %v1536_v23, %s2570_s11  ;;  %1532 = vrot.lane.b32.xlu1 %v1530_v25, %s2571_s5  ;;  %v1639_v26 = vrot.slane %v1530_v25, 4  ;;  %v1872_v17 = vsel %vm1866_vm4, %v3043_v47, %v1859_v7 }
0x1290   :  { %1640 = vrot.lane.b32.xlu1 %v1639_v26, %s2571_s5 }
0x12fe   :  { %v1538_v27 = vpop.permute.xlu0 %1537  ;;  %v1533_v28 = vpop.permute.xlu1 %1532 }
0x12ff   :  { %v1540_v29 = vsel %vm146_vm2, %v1533_v28, %v1538_v27 }
0x1300   :  { %v1542_v36 = vrot.slane %v1540_v29, 4 }
0x1302   :  { %v1641_v38 = vpop.permute.xlu1 %1640  ;;  %2320 = vmatmul.mubr.msk.f32.vlgmr.msra.gmra.mxu0 %vm264_vm3, %v1542_v36 }
0x1303   :  { %2331 = vmatmul.mubr.msk.f32.vlgmr.msra.gmra.mxu1 %vm146_vm2, %v1641_v38 }
0x1304   :  { %2334 = vmatpush3.msra.mxu1 %v2495_v40  ;;  %2349 = vmatprep.mubr.msk.f32.mxu1 %vm2569_vm1, %v2568_v5 }
0x1305   :  { %2335 = vmatprep.subr.mxu1 %v2568_v5 }
0x1306   :  { %2336 = vmatpush3.msra.mxu1 %v2496_v41 }
0x1307   :  { %2337 = vmatprep.subr.mxu1 %v2568_v5 }
0x1308   :  { %2338 = vmatpush3.msra.mxu1 %v2497_v42 }
0x1309   :  { %2339 = vmatprep.subr.mxu1 %v2568_v5 }
0x130a   :  { %2340 = vmatpush3.msra.mxu1 %v2498_v43 }
0x130b   :  { %2341 = vmatprep.subr.mxu1 %v2568_v5 }
0x130c   :  { %2342 = vmatpush3.msra.mxu1 %v2499_v44 }
0x130d   :  { %2343 = vmatprep.subr.mxu1 %v2568_v5 }
0x130e   :  { %2344 = vmatpush3.msra.mxu1 %v2500_v46 }
0x130f   :  { %2345 = vmatprep.subr.mxu1 %v2568_v5 }
0x1310   :  { %2346 = vmatpush3.msra.mxu1 %v2501_v48 }
0x1311   :  { %2347 = vmatprep.subr.mxu1 %v2568_v5 }
0x1312   :  { %2348 = vmatpush3.msra.mxu1 %v2502_v49 }
0x13c2   :  { %v1611_v50 = vpop.f32.mrf.mxu0 }
0x13c3   :  { %v1612_v14 = vadd.f32 %v3148_v51, %v1611_v50  ;;  %v1710_v52 = vpop.f32.mrf.mxu1 }
0x13c4   :  { %v1715_v53 = vrot.slane %v1710_v52, 2  ;;  %v2321_v54 = vpop.f32.mrf.mxu0 }
0x13c5   :  { %2467 = vtanh.f32 %v1612_v14  ;;  %v2332_v55 = vpop.f32.mrf.mxu1  ;;  %v1984_v30 = vmul.f32 -1.442695, %v1612_v14 }
0x13c6   :  { %v1717_v5 = vadd.f32 %v1715_v53, %v2697_v12 }
0x13c8   :  { %2469 = vtanh.f32 %v1717_v5  ;;  %v1986_v31 = vmul.f32 -1.442695, %v1717_v5 }
0x13c9   :  { %2471 = vpow2.f32 %v1984_v30 }
0x13ca   :  { %2473 = vpow2.f32 %v1986_v31 }
0x13d2   :  { %v2468_v56 = vpop.eup %2467 }
0x13d3   :  { %1624 = vrot.lane.b32.xlu0 %v2468_v56, %s2570_s11 }
0x13d5   :  { %v2470_v57 = vpop.eup %2469 }
0x13d6   :  { %1730 = vrot.lane.b32.xlu1 %v2470_v57, %s2570_s11  ;;  %v2472_v32 = vpop.eup %2471 }
0x13d7   :  { %v2474_v33 = vpop.eup %2473  ;;  %v1618_v34 = vadd.f32 1.0, %v2472_v32 }
0x13d8   :  { %v1721_v59 = vadd.f32 1.0, %v2474_v33 }
0x13d9   :  { %2475 = vrcp.f32 %v1618_v34 }
0x13da   :  { %2477 = vrcp.f32 %v1721_v59 }
0x13e6   :  { %v2476_v60 = vpop.eup %2475 }
0x13e7   :  { %v2478_v58 = vpop.eup %2477  ;;  %v1622_v37 = vmul.f32 %v2476_v60, %v3095_v16 }
0x13e8   :  { %v1728_v45 = vmul.f32 %v2478_v58, %v1726_v63 }
0x1445   :  { %v1625_v61 = vpop.permute.xlu0 %1624 }
0x1446   :  { %v1627_v12 = vmul.f32 %v2476_v60, %v1625_v61 }
0x1448   :  { %v1731_v35 = vpop.permute.xlu1 %1730  ;;  %1629 = vrot.lane.b32.xlu0 %v1627_v12, %s2571_s5 }
0x1449   :  { %v1733_v62 = vmul.f32 %v2478_v58, %v1731_v35 }
0x144b   :  { %1735 = vrot.lane.b32.xlu1 %v1733_v62, %s2571_s5 }
0x14ba   :  { %v1630_v39 = vpop.permute.xlu0 %1629 }
0x14bb   :  { %v1632_v1 = vadd.f32 %v1630_v39, %v1622_v37 }
0x14bd   :  { %2479 = vtanh.f32 %v1632_v1  ;;  %v1736_v2 = vpop.permute.xlu1 %1735 }
0x14be   :  { %v1738_v3 = vadd.f32 %v1736_v2, %v1728_v45 }
0x14c0   :  { %2481 = vtanh.f32 %v1738_v3 }
0x14ca   :  { %v2480_v4 = vpop.eup %2479 }
0x14cb   :  { %1635 = vrot.lane.b32.xlu0 %v2480_v4, %s2570_s11 }
0x14cd   :  { %v2482_v6 = vpop.eup %2481 }
0x14ce   :  { %1741 = vrot.lane.b32.xlu1 %v2482_v6, %s2570_s11 }
0x153d   :  { %v1636_v8 = vpop.permute.xlu0 %1635 }
0x153e   :  { %v1638_v9 = vmul.f32 %v2476_v60, %v1636_v8 }
0x1540   :  { %v1750_v10 = vrot.slane %v1638_v9, 2  ;;  %v1861_v11 = vrot.slane %v1638_v9, 4  ;;  %v1742_v13 = vpop.permute.xlu1 %1741 }
0x1541   :  { %v1744_v16 = vmul.f32 %v2478_v58, %v1742_v13 }
0x1542   :  { %1751 = vrot.lane.b32.xlu1 %v1750_v10, %s2570_s11  ;;  %v1873_v15 = vsel %vm1868_vm5, %v1872_v17, %v1861_v11 }
0x1543   :  { %1746 = vrot.lane.b32.xlu0 %v1744_v16, %s2571_s5 }
0x15b4   :  { %v1752_v18 = vpop.permute.xlu1 %1751 }
0x15b5   :  { %v1747_v19 = vpop.permute.xlu0 %1746 }
0x15b6   :  { %v1754_v20 = vsel %vm146_vm2, %v1747_v19, %v1752_v18  ;;  %1886 = vst.msk [vmem:[#allocation4 - $0x6] sm:$0xc0] %vm1885_vm7, %v1747_v19 }
0x15b7   :  { %v1756_v21 = vrot.slane %v1754_v20, 6 }
0x15b9   :  { %2350 = vmatmul.mubr.msk.f32.vlgmr.msra.gmra.mxu1 %vm264_vm3, %v1756_v21 }
0x1679   :  { %v1825_v22 = vpop.f32.mrf.mxu1 }
0x167a   :  { %v1826_v23 = vadd.f32 %v3148_v51, %v1825_v22 }
0x167b   :  { %v2351_v47 = vpop.f32.mrf.mxu1 }
0x167c   :  { %2483 = vtanh.f32 %v1826_v23  ;;  %v1988_v25 = vmul.f32 -1.442695, %v1826_v23 }
0x167e   :  { %2485 = vpow2.f32 %v1988_v25 }
0x1689   :  { %v2484_v24 = vpop.eup %2483 }
0x168a   :  { %1838 = vrot.lane.b32.xlu0 %v2484_v24, %s2570_s11 }
0x168b   :  { %v2486_v26 = vpop.eup %2485 }
0x168c   :  { %v1832_v27 = vadd.f32 1.0, %v2486_v26 }
0x168e   :  { %2487 = vrcp.f32 %v1832_v27 }
0x169b   :  { %v2488_v28 = vpop.eup %2487 }
0x169c   :  { %v1836_v38 = vmul.f32 %v2488_v28, %v1632_v1 }
0x16fc   :  { %v1839_v29 = vpop.permute.xlu0 %1838 }
0x16fd   :  { %v1841_v36 = vmul.f32 %v2488_v28, %v1839_v29 }
0x16ff   :  { %1843 = vrot.lane.b32.xlu1 %v1841_v36, %s2571_s5 }
0x1771   :  { %v1844_v40 = vpop.permute.xlu1 %1843 }
0x1772   :  { %v1846_v41 = vadd.f32 %v1844_v40, %v1836_v38 }
0x1774   :  { %2489 = vtanh.f32 %v1846_v41 }
0x1781   :  { %v2490_v42 = vpop.eup %2489 }
0x1782   :  { %1849 = vrot.lane.b32.xlu0 %v2490_v42, %s2570_s11  ;;  %s1921_s11 = sshll.u32 %s2573_s7, 4  ;;  %s1922_s11 = int_to_ptr.vmem [resolvable:$true] %s1921_s11 }
0x1783   :  { %s2504_s17 = scalar_lea.vmem %s1922_s11, 64  ;;  %p2509_p1 = scmp.lt.s32.totalorder %s1922_s11, %s1922_s11 }
0x1784   :  { %p2505_p0 = scmp.ne.s32.totalorder %s1922_s11, %s2504_s17  ;;  %p2510_p2 = scmp.lt.s32.totalorder %s2504_s17, %s2504_s17 }
0x1786   :  { %1877 = vrot.lane.b32.xlu0 %v2994_v0, %s2571_s5  ;;  %p2511_p3 = por %p2510_p2, %p2509_p1 }
0x1788   :  { %p2512_p4 = pnand %p2511_p3, %p2505_p0 }
0x178a   :  { %1894 = vrot.lane.b32.xlu0 %v1738_v3, %s2572_s6 }
0x17f4   :  { %v1850_v43 = vpop.permute.xlu0 %1849 }
0x17f5   :  { %v1852_v44 = vmul.f32 %v2488_v28, %v1850_v43 }
0x17f7   :  { %v1864_v46 = vrot.slane %v1852_v44, 2  ;;  %1887 = vrot.lane.b32.xlu1 %v1852_v44, %s2571_s5 }
0x17f8   :  { %v1878_v48 = vpop.permute.xlu0 %1877 }
0x17f9   :  { %1883 = vst.msk [vmem:[#allocation2] sm:$0xff] %vm146_vm2, %v1878_v48  ;;  %v1874_v49 = vsel %vm1870_vm6, %v1873_v15, %v1864_v46 }
0x17fb   :  { %1879 = vrot.lane.b32.xlu1 %v1874_v49, %s2571_s5 }
0x17fc   :  { %v1895_v50 = vpop.permute.xlu0 %1894 }
0x17fd   :  { %1897 = vst.msk [vmem:[#allocation6 - $0x6] sm:$0xc0] %vm1885_vm7, %v1895_v50 }
0x17ff   :  { %1899 = vrot.lane.b32.xlu1 %v1846_v41, %s2572_s6 }
0x1869   :  { %v1888_v0 = vpop.permute.xlu1 %1887 }
0x186a   :  { %1892 = vst.msk [vmem:[#allocation4 + $0x2] sm:$0x3] %vm1891_vm8, %v1888_v0 }
0x186b   :  { %2515 = shalt.err (!%p2512_p4)
}
0x186c   :  { %s2575_s18 = smov 2   ;;  %s2576_s4 = smov [#allocation6]  }
0x186d   :  { %1927 = dma.vmem_to_hbm [thread:$0]  %s1922_s11, 64, %s3207_s9, [#allocation5], %s2571_s5, %s2571_s5, %s2575_s18   ;;  %v1880_v51 = vpop.permute.xlu1 %1879 }
0x186e   :  { %s1933_s21 = sshll.u32 %s2576_s4, 4  ;;  %1884 = vst.msk [vmem:[#allocation2 + $0x8] sm:$0xff] %vm146_vm2, %v1880_v51  ;;  %s2524_s22 = scalar_lea.vmem %s1910_s16, 256  ;;  %s1934_s21 = int_to_ptr.vmem [resolvable:$true] %s1933_s21 }
0x186f   :  { %p2525_p5 = scmp.ne.s32.totalorder %s1910_s16, %s2524_s22  ;;  %p2529_p6 = scmp.lt.s32.totalorder %s1910_s16, %s1910_s16 }
0x1870   :  { %p2530_p7 = scmp.lt.s32.totalorder %s2524_s22, %s2524_s22 }
0x1872   :  { %p2531_p8 = por %p2530_p7, %p2529_p6 }
0x1874   :  { %p2532_p9 = pnand %p2531_p8, %p2525_p5 }
0x1876   :  { %2535 = shalt.err (!%p2532_p9)
}
0x1877   :  { %s2577_s3 = smov 128   ;;  %s2578_s0 = smov 8   ;;  %v1900_v14 = vpop.permute.xlu1 %1899 }
0x1878   :  { %1915 = dma.vmem_to_hbm [thread:$0]  %s1910_s16, 256, %s3206_s8, [#allocation3], %s2577_s3, %s2577_s3, %s2578_s0   ;;  %1903 = vst.msk [vmem:[#allocation6 + $0x2] sm:$0x3] %vm1891_vm8, %v1900_v14 }
0x1879   :  { %s2544_s9 = scalar_lea.vmem %s1934_s21, 64  ;;  %p2549_p11 = scmp.lt.s32.totalorder %s1934_s21, %s1934_s21 }
0x187a   :  { %p2545_p10 = scmp.ne.s32.totalorder %s1934_s21, %s2544_s9  ;;  %p2550_p12 = scmp.lt.s32.totalorder %s2544_s9, %s2544_s9 }
0x187c   :  { %p2551_p13 = por %p2550_p12, %p2549_p11 }
0x187e   :  { %p2552_p0 = pnand %p2551_p13, %p2545_p10 }
0x1880   :  { %2555 = shalt.err (!%p2552_p0)
}
0x1881   :  { %1939 = dma.vmem_to_hbm [thread:$0]  %s1934_s21, 64, %s3208_s10, [#allocation5], %s2571_s5, %s2571_s5, %s2575_s18  }
0x1882   :  { %2564 = dma.done.wait [#allocation3], 256  }
0x1883   :  { %2565 = vsyncadd [#allocation3], 4294967040 }
0x1884   :  { %2566 = dma.done.wait [#allocation5], 128  }
0x1885   :  { %2567 = vsyncadd [#allocation5], 4294967168 }
0x1886   :  { %1949 = vsyncpa [#allocation3], 1 }
0x1887   :  { %1950 = vsyncpa [#allocation5], 1 }

</bundles_post_ra>
